<compile_context>
chip_gen: v5e
topology: v5e:2x2
jax: 0.10.0
libtpu: 0.0.40
codegen_flags: <defaults>
</compile_context>

<pallas_src>
import functools

import jax
import jax.numpy as jnp
from jax.experimental import pallas as pl
from jax.experimental.pallas import tpu as pltpu


# ----------------- fused conv front-end: bank(1..K) + maxpool + proj1 + proj2 + residual -------

def _frontend_kernel(x_ref, wb_ref, bb_ref, w1_ref, b1_ref, w2_ref, b2_ref, o_ref,
                     bank_scr, pp_scr, h1_scr):
    T = o_ref.shape[1]
    Cin = o_ref.shape[2]
    K = wb_ref.shape[0]
    KC = wb_ref.shape[2]
    pk = w1_ref.shape[0]
    P = w1_ref.shape[2]
    Lmax = (K - 1) // 2
    p1l = (pk - 1) // 2

    x = x_ref[0]                                                    # (T + K - 1, Cin)

    # conv bank: all K kernel sizes packed into one K-tap conv (zero taps outside each kernel's
    # support, output channels concatenated) + ReLU.
    acc = jnp.zeros((T, KC), jnp.float32)
    for j in range(K):                                              # small static unroll
        acc = acc + jnp.dot(x[j:j + T, :], wb_ref[j], preferred_element_type=jnp.float32)
    acc = jnp.maximum(acc + bb_ref[...], 0.0)

    # ConstantPad1d((0, 1)) + MaxPool1d(2, stride=1)
    bank_scr[0:T, :] = acc
    bank_scr[T:T + 1, :] = jnp.zeros((1, KC), jnp.float32)
    pooled = jnp.maximum(bank_scr[0:T, :], bank_scr[1:T + 1, :])

    # projection conv 1 ('same' padding) + ReLU
    pp_scr[...] = jnp.zeros(pp_scr.shape, jnp.float32)
    pp_scr[p1l:p1l + T, :] = pooled
    acc1 = jnp.zeros((T, P), jnp.float32)
    for j in range(pk):
        acc1 = acc1 + jnp.dot(pp_scr[j:j + T, :], w1_ref[j], preferred_element_type=jnp.float32)
    acc1 = jnp.maximum(acc1 + b1_ref[...], 0.0)

    # projection conv 2 ('same' padding, identity) + residual
    h1_scr[...] = jnp.zeros(h1_scr.shape, jnp.float32)
    h1_scr[p1l:p1l + T, :] = acc1
    acc2 = jnp.zeros((T, Cin), jnp.float32)
    for j in range(pk):
        acc2 = acc2 + jnp.dot(h1_scr[j:j + T, :], w2_ref[j], preferred_element_type=jnp.float32)
    residual = x[Lmax:Lmax + T, :]
    o_ref[0] = (acc2 + b2_ref[...] + residual).astype(o_ref.dtype)


def conv_frontend(x_btc, wbank, bbank, w1, b1, w2, b2):
    B, T, Cin = x_btc.shape
    K, _, KC = wbank.shape
    pk, _, P = w1.shape
    Lmax = (K - 1) // 2
    x_pad = jnp.pad(x_btc, ((0, 0), (Lmax, K - 1 - Lmax), (0, 0)))  # single pad for all kernels
    Tp = T + K - 1

    flops = 2 * B * T * (K * Cin * KC + pk * KC * P + pk * P * Cin)
    bytes_accessed = 4 * (B * Tp * Cin + K * Cin * KC + pk * KC * P + pk * P * Cin + B * T * Cin)

    return pl.pallas_call(
        _frontend_kernel,
        out_shape=jax.ShapeDtypeStruct((B, T, Cin), jnp.float32),
        grid=(B,),
        in_specs=[
            pl.BlockSpec((1, Tp, Cin), lambda i: (i, 0, 0)),
            pl.BlockSpec((K, Cin, KC), lambda i: (0, 0, 0)),
            pl.BlockSpec((1, KC), lambda i: (0, 0)),
            pl.BlockSpec((pk, KC, P), lambda i: (0, 0, 0)),
            pl.BlockSpec((1, P), lambda i: (0, 0)),
            pl.BlockSpec((pk, P, Cin), lambda i: (0, 0, 0)),
            pl.BlockSpec((1, Cin), lambda i: (0, 0)),
        ],
        out_specs=pl.BlockSpec((1, T, Cin), lambda i: (i, 0, 0)),
        scratch_shapes=[
            pltpu.VMEM((T + 1, KC), jnp.float32),          # bank output + maxpool zero row
            pltpu.VMEM((T + pk - 1, KC), jnp.float32),     # padded pooled input for proj1
            pltpu.VMEM((T + pk - 1, P), jnp.float32),      # padded proj1 output for proj2
        ],
        compiler_params=pltpu.CompilerParams(dimension_semantics=("parallel",)),
        cost_estimate=pl.CostEstimate(flops=flops, transcendentals=0,
                                      bytes_accessed=bytes_accessed),
    )(x_pad, wbank, bbank, w1, b1, w2, b2)


# ----------------- Linear + ReLU + 4 Highway layers + GRU input-gate precompute -----------------

def _highway_gates_kernel(x_ref, w0_ref, b0_ref, wl_ref, bl_ref, wg_ref, bg_ref,
                          wih_ref, bih_ref, o_ref, *, n_layers):
    h = jnp.dot(x_ref[...], w0_ref[...], preferred_element_type=jnp.float32) + b0_ref[...]
    h = jnp.maximum(h, 0.0)
    for i in range(n_layers):
        lin = jnp.maximum(
            jnp.dot(h, wl_ref[i], preferred_element_type=jnp.float32) + bl_ref[i], 0.0)
        gate = jax.nn.sigmoid(
            jnp.dot(h, wg_ref[i], preferred_element_type=jnp.float32) + bg_ref[i])
        h = lin * gate + h * (1.0 - gate)
    # precompute GRU input gates for both directions: [r|z|n]_fwd | [r|z|n]_bwd
    o_ref[...] = (jnp.dot(h, wih_ref[...], preferred_element_type=jnp.float32)
                  + bih_ref[...]).astype(o_ref.dtype)


def highway_gates(x_rows, w0_t, b0, wl_t, bl, wg_t, bg, wih_cat, bih_cat):
    R, Cin = x_rows.shape
    H = w0_t.shape[1]
    G = wih_cat.shape[1]
    n_layers = wl_t.shape[0]
    flops = 2 * R * (Cin * H + 2 * n_layers * H * H + H * G)
    bytes_accessed = 4 * (R * Cin + R * G + Cin * H + 2 * n_layers * H * H + H * G)
    return pl.pallas_call(
        functools.partial(_highway_gates_kernel, n_layers=n_layers),
        out_shape=jax.ShapeDtypeStruct((R, G), jnp.float32),
        cost_estimate=pl.CostEstimate(flops=flops, transcendentals=n_layers * R * H,
                                      bytes_accessed=bytes_accessed),
    )(x_rows, w0_t, b0, wl_t, bl, wg_t, bg, wih_cat, bih_cat)


# ----------------- Batched bidirectional GRU with per-sequence lengths -------------------------

def _bigru_kernel(len_ref, gi_ref, whh_ref, bhh_ref, o_ref, hf_scr, hb_scr):
    T = gi_ref.shape[0]
    B = gi_ref.shape[1]
    Hh = whh_ref.shape[1]

    lengths = len_ref[...]                                          # (B, 1) int32
    whh_f = whh_ref[0]                                              # (Hh, 3Hh)
    whh_b = whh_ref[1]
    bhh_f = bhh_ref[0]                                              # (1, 3Hh)
    bhh_b = bhh_ref[1]
    hf_scr[...] = jnp.zeros((B, Hh), jnp.float32)
    hb_scr[...] = jnp.zeros((B, Hh), jnp.float32)

    def cell(gx, h, whh, bhh):
        gh = jnp.dot(h, whh, preferred_element_type=jnp.float32) + bhh
        r = jax.nn.sigmoid(gx[:, 0:Hh] + gh[:, 0:Hh])
        z = jax.nn.sigmoid(gx[:, Hh:2 * Hh] + gh[:, Hh:2 * Hh])
        n = jnp.tanh(gx[:, 2 * Hh:3 * Hh] + r * gh[:, 2 * Hh:3 * Hh])
        return (1.0 - z) * n + z * h

    @pl.loop(0, T)
    def _(s):
        # forward direction, position s
        row_f = gi_ref[s]                                           # (B, 6Hh) dynamic row slice
        h_f = hf_scr[...]
        h_new_f = cell(row_f[:, 0:3 * Hh], h_f, whh_f, bhh_f)
        valid_f = lengths > s                                       # (B, 1) packed-seq mask
        hf_scr[...] = jnp.where(valid_f, h_new_f, h_f)
        o_ref[s, :, 0:Hh] = jnp.where(valid_f, h_new_f, 0.0)        # padded positions stay zero

        # backward direction, position T - 1 - s
        p = T - 1 - s
        row_b = gi_ref[p]
        h_b = hb_scr[...]
        h_new_b = cell(row_b[:, 3 * Hh:6 * Hh], h_b, whh_b, bhh_b)
        valid_b = lengths > p
        hb_scr[...] = jnp.where(valid_b, h_new_b, h_b)
        o_ref[p, :, Hh:2 * Hh] = jnp.where(valid_b, h_new_b, 0.0)


def bi_gru(lengths, gi_tbg, whh_t, bhh):
    T, B, _ = gi_tbg.shape
    Hh = whh_t.shape[1]
    lengths_col = lengths.reshape(B, 1).astype(jnp.int32)
    bhh_r = bhh.reshape(2, 1, 3 * Hh)
    return pl.pallas_call(
        _bigru_kernel,
        out_shape=jax.ShapeDtypeStruct((T, B, 2 * Hh), jnp.float32),
        scratch_shapes=[pltpu.VMEM((B, Hh), jnp.float32),
                        pltpu.VMEM((B, Hh), jnp.float32)],
    )(lengths_col, gi_tbg, whh_t, bhh_r)


# ----------------- Output linear (batch-flattened rows) -----------------------------------------

def _linear_kernel(x_ref, w_ref, b_ref, o_ref):
    o_ref[...] = (jnp.dot(x_ref[...], w_ref[...], preferred_element_type=jnp.float32)
                  + b_ref[...]).astype(o_ref.dtype)


def linear_rows(x_rows, w_t, b_row):
    R = x_rows.shape[0]
    Cout = w_t.shape[1]
    return pl.pallas_call(
        _linear_kernel,
        out_shape=jax.ShapeDtypeStruct((R, Cout), jnp.float32),
    )(x_rows, w_t, b_row)


# ----------------- parameter folding / packing --------------------------------------------------

def _fold_bn_conv(w, gamma, beta, mean, var, eps=1e-5):
    scale = gamma / jnp.sqrt(var + eps)
    w_eff = jnp.transpose(w * scale[:, None, None], (2, 1, 0))      # (k, Cin, Cout)
    b_eff = beta - mean * scale                                     # (Cout,)
    return w_eff.astype(jnp.float32), b_eff.astype(jnp.float32)


def _pack_bank(bank_params):
    """Pack bank convs (kernel sizes 1..K) into one K-tap conv with concatenated out-channels."""
    K = len(bank_params)
    Lmax = (K - 1) // 2
    bank_ch = bank_params[0]['w'].shape[0]
    Cin = bank_params[0]['w'].shape[1]
    W = jnp.zeros((K, Cin, K * bank_ch), jnp.float32)
    biases = []
    for idx, p in enumerate(bank_params):
        k = idx + 1
        w_k, b_k = _fold_bn_conv(p['w'], p['gamma'], p['beta'], p['mean'], p['var'])
        off = Lmax - (k - 1) // 2                                   # aligns each kernel's 'same' pad
        W = W.at[off:off + k, :, idx * bank_ch:(idx + 1) * bank_ch].set(w_k)
        biases.append(b_k)
    b = jnp.concatenate(biases).reshape(1, K * bank_ch)
    return W, b


# ----------------- Full PostnetCBHG forward ------------------------------------------------------

def postnet_cbhg_forward(params, x_nct, x_lengths):
    """x_nct: (B, input_dim, T) like PyTorch; x_lengths: (B,) int32. Returns (B, output_dim, T)."""
    x = jnp.transpose(x_nct, (0, 2, 1)).astype(jnp.float32)         # (B, T, Cin)
    B, T, Cin = x.shape

    # fold BN into conv weights (eval mode), pack the conv bank
    wbank, bbank = _pack_bank(params['bank'])
    p1 = params['proj1']
    w1, b1 = _fold_bn_conv(p1['w'], p1['gamma'], p1['beta'], p1['mean'], p1['var'])
    p2 = params['proj2']
    w2, b2 = _fold_bn_conv(p2['w'], p2['gamma'], p2['beta'], p2['mean'], p2['var'])

    # 1) fused conv bank + maxpool + projections + residual
    y = conv_frontend(x, wbank, bbank, w1, b1.reshape(1, -1), w2, b2.reshape(1, -1))

    # 2) highway stack + GRU input-gate precompute on batch-flattened, time-major rows
    hw = params['highway']
    gp = params['gru']
    Hh = gp['whh_t'].shape[1]
    wih_cat = jnp.concatenate([gp['wih_t'][0], gp['wih_t'][1]], axis=1)         # (H, 6Hh)
    bih_cat = jnp.concatenate([gp['bih'][0], gp['bih'][1]]).reshape(1, 6 * Hh)
    y_rows = jnp.transpose(y, (1, 0, 2)).reshape(T * B, Cin)
    gi = highway_gates(y_rows, hw['w0_t'], hw['b0'], hw['wl_t'], hw['bl'],
                       hw['wg_t'], hw['bg'], wih_cat, bih_cat)                  # (T*B, 6Hh)

    # 3) batched bidirectional GRU over valid prefixes (padded positions -> zeros)
    g = bi_gru(x_lengths, gi.reshape(T, B, 6 * Hh), gp['whh_t'], gp['bhh'])     # (T, B, 2Hh)

    # 4) output projection (applied to zeros at padded positions -> bias, matching PyTorch)
    out_p = params['out']
    y_out = linear_rows(g.reshape(T * B, 2 * Hh), out_p['w_t'], out_p['b'].reshape(1, -1))
    Dout = out_p['w_t'].shape[1]
    return jnp.transpose(y_out.reshape(T, B, Dout), (1, 2, 0))                  # (B, output_dim, T)


# ----------------- Deterministic parameter init --------------------------------------------------

def init_params(key, cfg):
    keys = iter(jax.random.split(key, 96))

    def nrm(shape, scale=0.1):
        return (scale * jax.random.normal(next(keys), shape)).astype(jnp.float32)

    def bn(c):
        return dict(gamma=1.0 + nrm((c,)), beta=nrm((c,)),
                    mean=nrm((c,)), var=1.0 + jnp.abs(nrm((c,))))

    params = {'bank': []}
    for k in range(1, cfg['bank_size'] + 1):
        p = dict(w=nrm((cfg['bank_channels'], cfg['input_dim'], k)))
        p.update(bn(cfg['bank_channels']))
        params['bank'].append(p)

    pk = cfg['projection_kernel_size']
    p1 = dict(w=nrm((cfg['projection_channels'], cfg['bank_channels'] * cfg['bank_size'], pk)))
    p1.update(bn(cfg['projection_channels']))
    params['proj1'] = p1
    p2 = dict(w=nrm((cfg['input_dim'], cfg['projection_channels'], pk)))
    p2.update(bn(cfg['input_dim']))
    params['proj2'] = p2

    H = cfg['highway_dim']
    params['highway'] = dict(
        w0_t=nrm((cfg['input_dim'], H)), b0=nrm((1, H)),
        wl_t=nrm((4, H, H)), bl=nrm((4, H)),
        wg_t=nrm((4, H, H)), bg=nrm((4, H)),
    )

    Hh = cfg['gru_dim'] // 2
    params['gru'] = dict(
        wih_t=nrm((2, H, 3 * Hh)),      # per direction, transposed: x @ W_ih.T, gates [r|z|n]
        whh_t=nrm((2, Hh, 3 * Hh)),
        bih=nrm((2, 3 * Hh)),
        bhh=nrm((2, 3 * Hh)),
    )
    params['out'] = dict(w_t=nrm((cfg['gru_dim'], cfg['output_dim'])),
                         b=nrm((cfg['output_dim'],)))
    return params


if __name__ == "__main__":
    cfg = dict(input_dim=8, output_dim=8, bank_size=4, bank_channels=8,
               projection_channels=16, projection_kernel_size=3,
               highway_dim=16, gru_dim=16, dropout=0.0)

    key = jax.random.PRNGKey(0)
    pkey, xkey = jax.random.split(key)
    params = init_params(pkey, cfg)

    B, T = 2, 16
    x = jax.random.normal(xkey, (B, cfg['input_dim'], T), jnp.float32)
    x_lengths = jnp.array([16, 11], dtype=jnp.int32)

    fwd = jax.jit(postnet_cbhg_forward)
    y = fwd(params, x, x_lengths)
    jax.block_until_ready(y)

    assert y.shape == (B, cfg['output_dim'], T), y.shape
    assert jnp.all(jnp.isfinite(y))
    print("KERNEL_OK")
</pallas_src>

<mosaic_0001>
module attributes {stable_mosaic.version = 11 : i64} {
  func.func @_highway_gates_kernel(%arg0: memref<32x8xf32, #tpu.memory_space<vmem>>, %arg1: memref<8x16xf32, #tpu.memory_space<vmem>>, %arg2: memref<1x16xf32, #tpu.memory_space<vmem>>, %arg3: memref<4x16x16xf32, #tpu.memory_space<vmem>>, %arg4: memref<4x16xf32, #tpu.memory_space<vmem>>, %arg5: memref<4x16x16xf32, #tpu.memory_space<vmem>>, %arg6: memref<4x16xf32, #tpu.memory_space<vmem>>, %arg7: memref<16x48xf32, #tpu.memory_space<vmem>>, %arg8: memref<1x48xf32, #tpu.memory_space<vmem>>, %arg9: memref<32x48xf32, #tpu.memory_space<vmem>>) attributes {dimension_semantics = [], scalar_prefetch = 0 : i64, scratch_operands = 0 : i64, tpu.core_type = #tpu.core_type<tc>} {
    %c0 = arith.constant 0 : index
    %c0_0 = arith.constant 0 : index
    %0 = vector.load %arg0[%c0, %c0_0] : memref<32x8xf32, #tpu.memory_space<vmem>>, vector<32x8xf32>
    %c0_1 = arith.constant 0 : index
    %c0_2 = arith.constant 0 : index
    %1 = vector.load %arg1[%c0_1, %c0_2] : memref<8x16xf32, #tpu.memory_space<vmem>>, vector<8x16xf32>
    %cst = arith.constant dense<0.000000e+00> : vector<32x16xf32>
    %2 = tpu.matmul %0, %1, %cst {dimension_numbers = #tpu.dot_dimension_numbers<[1], [0], [0], [1], [0, 0, 1, 1], [], []>} : vector<32x8xf32>, vector<8x16xf32>, vector<32x16xf32> -> vector<32x16xf32>
    %c0_3 = arith.constant 0 : index
    %c0_4 = arith.constant 0 : index
    %3 = vector.load %arg2[%c0_3, %c0_4] : memref<1x16xf32, #tpu.memory_space<vmem>>, vector<1x16xf32>
    %4 = vector.broadcast %3 : vector<1x16xf32> to vector<32x16xf32>
    %5 = arith.addf %2, %4 : vector<32x16xf32>
    %cst_5 = arith.constant 0.000000e+00 : f32
    %6 = vector.broadcast %cst_5 : f32 to vector<32x16xf32>
    %7 = arith.maximumf %5, %6 : vector<32x16xf32>
    %c0_6 = arith.constant 0 : index
    %c0_7 = arith.constant 0 : index
    %c0_8 = arith.constant 0 : index
    %8 = vector.load %arg3[%c0_6, %c0_7, %c0_8] : memref<4x16x16xf32, #tpu.memory_space<vmem>>, vector<1x16x16xf32>
    %9 = vector.shape_cast %8 : vector<1x16x16xf32> to vector<16x16xf32>
    %cst_9 = arith.constant dense<0.000000e+00> : vector<32x16xf32>
    %10 = tpu.matmul %7, %9, %cst_9 {dimension_numbers = #tpu.dot_dimension_numbers<[1], [0], [0], [1], [0, 0, 1, 1], [], []>} : vector<32x16xf32>, vector<16x16xf32>, vector<32x16xf32> -> vector<32x16xf32>
    %c0_10 = arith.constant 0 : index
    %c0_11 = arith.constant 0 : index
    %11 = vector.load %arg4[%c0_10, %c0_11] : memref<4x16xf32, #tpu.memory_space<vmem>>, vector<1x16xf32>
    %12 = vector.shape_cast %11 : vector<1x16xf32> to vector<16xf32>
    %13 = vector.shape_cast %12 : vector<16xf32> to vector<1x16xf32>
    %14 = vector.broadcast %13 : vector<1x16xf32> to vector<32x16xf32>
    %15 = arith.addf %10, %14 : vector<32x16xf32>
    %cst_12 = arith.constant 0.000000e+00 : f32
    %16 = vector.broadcast %cst_12 : f32 to vector<32x16xf32>
    %17 = arith.maximumf %15, %16 : vector<32x16xf32>
    %c0_13 = arith.constant 0 : index
    %c0_14 = arith.constant 0 : index
    %c0_15 = arith.constant 0 : index
    %18 = vector.load %arg5[%c0_13, %c0_14, %c0_15] : memref<4x16x16xf32, #tpu.memory_space<vmem>>, vector<1x16x16xf32>
    %19 = vector.shape_cast %18 : vector<1x16x16xf32> to vector<16x16xf32>
    %cst_16 = arith.constant dense<0.000000e+00> : vector<32x16xf32>
    %20 = tpu.matmul %7, %19, %cst_16 {dimension_numbers = #tpu.dot_dimension_numbers<[1], [0], [0], [1], [0, 0, 1, 1], [], []>} : vector<32x16xf32>, vector<16x16xf32>, vector<32x16xf32> -> vector<32x16xf32>
    %c0_17 = arith.constant 0 : index
    %c0_18 = arith.constant 0 : index
    %21 = vector.load %arg6[%c0_17, %c0_18] : memref<4x16xf32, #tpu.memory_space<vmem>>, vector<1x16xf32>
    %22 = vector.shape_cast %21 : vector<1x16xf32> to vector<16xf32>
    %23 = vector.shape_cast %22 : vector<16xf32> to vector<1x16xf32>
    %24 = vector.broadcast %23 : vector<1x16xf32> to vector<32x16xf32>
    %25 = arith.addf %20, %24 : vector<32x16xf32>
    %26 = arith.negf %25 : vector<32x16xf32>
    %27 = math.exp %26 : vector<32x16xf32>
    %cst_19 = arith.constant 1.000000e+00 : f32
    %28 = vector.broadcast %cst_19 : f32 to vector<32x16xf32>
    %29 = arith.addf %28, %27 : vector<32x16xf32>
    %30 = arith.divf %28, %29 : vector<32x16xf32>
    %31 = arith.mulf %17, %30 : vector<32x16xf32>
    %cst_20 = arith.constant 1.000000e+00 : f32
    %32 = vector.broadcast %cst_20 : f32 to vector<32x16xf32>
    %33 = arith.subf %32, %30 : vector<32x16xf32>
    %34 = arith.mulf %7, %33 : vector<32x16xf32>
    %35 = arith.addf %31, %34 : vector<32x16xf32>
    %c1 = arith.constant 1 : index
    %c0_21 = arith.constant 0 : index
    %c0_22 = arith.constant 0 : index
    %36 = vector.load %arg3[%c1, %c0_21, %c0_22] : memref<4x16x16xf32, #tpu.memory_space<vmem>>, vector<1x16x16xf32>
    %37 = vector.shape_cast %36 : vector<1x16x16xf32> to vector<16x16xf32>
    %cst_23 = arith.constant dense<0.000000e+00> : vector<32x16xf32>
    %38 = tpu.matmul %35, %37, %cst_23 {dimension_numbers = #tpu.dot_dimension_numbers<[1], [0], [0], [1], [0, 0, 1, 1], [], []>} : vector<32x16xf32>, vector<16x16xf32>, vector<32x16xf32> -> vector<32x16xf32>
    %c1_24 = arith.constant 1 : index
    %c0_25 = arith.constant 0 : index
    %39 = vector.load %arg4[%c1_24, %c0_25] : memref<4x16xf32, #tpu.memory_space<vmem>>, vector<1x16xf32>
    %40 = vector.shape_cast %39 : vector<1x16xf32> to vector<16xf32>
    %41 = vector.shape_cast %40 : vector<16xf32> to vector<1x16xf32>
    %42 = vector.broadcast %41 : vector<1x16xf32> to vector<32x16xf32>
    %43 = arith.addf %38, %42 : vector<32x16xf32>
    %cst_26 = arith.constant 0.000000e+00 : f32
    %44 = vector.broadcast %cst_26 : f32 to vector<32x16xf32>
    %45 = arith.maximumf %43, %44 : vector<32x16xf32>
    %c1_27 = arith.constant 1 : index
    %c0_28 = arith.constant 0 : index
    %c0_29 = arith.constant 0 : index
    %46 = vector.load %arg5[%c1_27, %c0_28, %c0_29] : memref<4x16x16xf32, #tpu.memory_space<vmem>>, vector<1x16x16xf32>
    %47 = vector.shape_cast %46 : vector<1x16x16xf32> to vector<16x16xf32>
    %cst_30 = arith.constant dense<0.000000e+00> : vector<32x16xf32>
    %48 = tpu.matmul %35, %47, %cst_30 {dimension_numbers = #tpu.dot_dimension_numbers<[1], [0], [0], [1], [0, 0, 1, 1], [], []>} : vector<32x16xf32>, vector<16x16xf32>, vector<32x16xf32> -> vector<32x16xf32>
    %c1_31 = arith.constant 1 : index
    %c0_32 = arith.constant 0 : index
    %49 = vector.load %arg6[%c1_31, %c0_32] : memref<4x16xf32, #tpu.memory_space<vmem>>, vector<1x16xf32>
    %50 = vector.shape_cast %49 : vector<1x16xf32> to vector<16xf32>
    %51 = vector.shape_cast %50 : vector<16xf32> to vector<1x16xf32>
    %52 = vector.broadcast %51 : vector<1x16xf32> to vector<32x16xf32>
    %53 = arith.addf %48, %52 : vector<32x16xf32>
    %54 = arith.negf %53 : vector<32x16xf32>
    %55 = math.exp %54 : vector<32x16xf32>
    %cst_33 = arith.constant 1.000000e+00 : f32
    %56 = vector.broadcast %cst_33 : f32 to vector<32x16xf32>
    %57 = arith.addf %56, %55 : vector<32x16xf32>
    %58 = arith.divf %56, %57 : vector<32x16xf32>
    %59 = arith.mulf %45, %58 : vector<32x16xf32>
    %cst_34 = arith.constant 1.000000e+00 : f32
    %60 = vector.broadcast %cst_34 : f32 to vector<32x16xf32>
    %61 = arith.subf %60, %58 : vector<32x16xf32>
    %62 = arith.mulf %35, %61 : vector<32x16xf32>
    %63 = arith.addf %59, %62 : vector<32x16xf32>
    %c2 = arith.constant 2 : index
    %c0_35 = arith.constant 0 : index
    %c0_36 = arith.constant 0 : index
    %64 = vector.load %arg3[%c2, %c0_35, %c0_36] : memref<4x16x16xf32, #tpu.memory_space<vmem>>, vector<1x16x16xf32>
    %65 = vector.shape_cast %64 : vector<1x16x16xf32> to vector<16x16xf32>
    %cst_37 = arith.constant dense<0.000000e+00> : vector<32x16xf32>
    %66 = tpu.matmul %63, %65, %cst_37 {dimension_numbers = #tpu.dot_dimension_numbers<[1], [0], [0], [1], [0, 0, 1, 1], [], []>} : vector<32x16xf32>, vector<16x16xf32>, vector<32x16xf32> -> vector<32x16xf32>
    %c2_38 = arith.constant 2 : index
    %c0_39 = arith.constant 0 : index
    %67 = vector.load %arg4[%c2_38, %c0_39] : memref<4x16xf32, #tpu.memory_space<vmem>>, vector<1x16xf32>
    %68 = vector.shape_cast %67 : vector<1x16xf32> to vector<16xf32>
    %69 = vector.shape_cast %68 : vector<16xf32> to vector<1x16xf32>
    %70 = vector.broadcast %69 : vector<1x16xf32> to vector<32x16xf32>
    %71 = arith.addf %66, %70 : vector<32x16xf32>
    %cst_40 = arith.constant 0.000000e+00 : f32
    %72 = vector.broadcast %cst_40 : f32 to vector<32x16xf32>
    %73 = arith.maximumf %71, %72 : vector<32x16xf32>
    %c2_41 = arith.constant 2 : index
    %c0_42 = arith.constant 0 : index
    %c0_43 = arith.constant 0 : index
    %74 = vector.load %arg5[%c2_41, %c0_42, %c0_43] : memref<4x16x16xf32, #tpu.memory_space<vmem>>, vector<1x16x16xf32>
    %75 = vector.shape_cast %74 : vector<1x16x16xf32> to vector<16x16xf32>
    %cst_44 = arith.constant dense<0.000000e+00> : vector<32x16xf32>
    %76 = tpu.matmul %63, %75, %cst_44 {dimension_numbers = #tpu.dot_dimension_numbers<[1], [0], [0], [1], [0, 0, 1, 1], [], []>} : vector<32x16xf32>, vector<16x16xf32>, vector<32x16xf32> -> vector<32x16xf32>
    %c2_45 = arith.constant 2 : index
    %c0_46 = arith.constant 0 : index
    %77 = vector.load %arg6[%c2_45, %c0_46] : memref<4x16xf32, #tpu.memory_space<vmem>>, vector<1x16xf32>
    %78 = vector.shape_cast %77 : vector<1x16xf32> to vector<16xf32>
    %79 = vector.shape_cast %78 : vector<16xf32> to vector<1x16xf32>
    %80 = vector.broadcast %79 : vector<1x16xf32> to vector<32x16xf32>
    %81 = arith.addf %76, %80 : vector<32x16xf32>
    %82 = arith.negf %81 : vector<32x16xf32>
    %83 = math.exp %82 : vector<32x16xf32>
    %cst_47 = arith.constant 1.000000e+00 : f32
    %84 = vector.broadcast %cst_47 : f32 to vector<32x16xf32>
    %85 = arith.addf %84, %83 : vector<32x16xf32>
    %86 = arith.divf %84, %85 : vector<32x16xf32>
    %87 = arith.mulf %73, %86 : vector<32x16xf32>
    %cst_48 = arith.constant 1.000000e+00 : f32
    %88 = vector.broadcast %cst_48 : f32 to vector<32x16xf32>
    %89 = arith.subf %88, %86 : vector<32x16xf32>
    %90 = arith.mulf %63, %89 : vector<32x16xf32>
    %91 = arith.addf %87, %90 : vector<32x16xf32>
    %c3 = arith.constant 3 : index
    %c0_49 = arith.constant 0 : index
    %c0_50 = arith.constant 0 : index
    %92 = vector.load %arg3[%c3, %c0_49, %c0_50] : memref<4x16x16xf32, #tpu.memory_space<vmem>>, vector<1x16x16xf32>
    %93 = vector.shape_cast %92 : vector<1x16x16xf32> to vector<16x16xf32>
    %cst_51 = arith.constant dense<0.000000e+00> : vector<32x16xf32>
    %94 = tpu.matmul %91, %93, %cst_51 {dimension_numbers = #tpu.dot_dimension_numbers<[1], [0], [0], [1], [0, 0, 1, 1], [], []>} : vector<32x16xf32>, vector<16x16xf32>, vector<32x16xf32> -> vector<32x16xf32>
    %c3_52 = arith.constant 3 : index
    %c0_53 = arith.constant 0 : index
    %95 = vector.load %arg4[%c3_52, %c0_53] : memref<4x16xf32, #tpu.memory_space<vmem>>, vector<1x16xf32>
    %96 = vector.shape_cast %95 : vector<1x16xf32> to vector<16xf32>
    %97 = vector.shape_cast %96 : vector<16xf32> to vector<1x16xf32>
    %98 = vector.broadcast %97 : vector<1x16xf32> to vector<32x16xf32>
    %99 = arith.addf %94, %98 : vector<32x16xf32>
    %cst_54 = arith.constant 0.000000e+00 : f32
    %100 = vector.broadcast %cst_54 : f32 to vector<32x16xf32>
    %101 = arith.maximumf %99, %100 : vector<32x16xf32>
    %c3_55 = arith.constant 3 : index
    %c0_56 = arith.constant 0 : index
    %c0_57 = arith.constant 0 : index
    %102 = vector.load %arg5[%c3_55, %c0_56, %c0_57] : memref<4x16x16xf32, #tpu.memory_space<vmem>>, vector<1x16x16xf32>
    %103 = vector.shape_cast %102 : vector<1x16x16xf32> to vector<16x16xf32>
    %cst_58 = arith.constant dense<0.000000e+00> : vector<32x16xf32>
    %104 = tpu.matmul %91, %103, %cst_58 {dimension_numbers = #tpu.dot_dimension_numbers<[1], [0], [0], [1], [0, 0, 1, 1], [], []>} : vector<32x16xf32>, vector<16x16xf32>, vector<32x16xf32> -> vector<32x16xf32>
    %c3_59 = arith.constant 3 : index
    %c0_60 = arith.constant 0 : index
    %105 = vector.load %arg6[%c3_59, %c0_60] : memref<4x16xf32, #tpu.memory_space<vmem>>, vector<1x16xf32>
    %106 = vector.shape_cast %105 : vector<1x16xf32> to vector<16xf32>
    %107 = vector.shape_cast %106 : vector<16xf32> to vector<1x16xf32>
    %108 = vector.broadcast %107 : vector<1x16xf32> to vector<32x16xf32>
    %109 = arith.addf %104, %108 : vector<32x16xf32>
    %110 = arith.negf %109 : vector<32x16xf32>
    %111 = math.exp %110 : vector<32x16xf32>
    %cst_61 = arith.constant 1.000000e+00 : f32
    %112 = vector.broadcast %cst_61 : f32 to vector<32x16xf32>
    %113 = arith.addf %112, %111 : vector<32x16xf32>
    %114 = arith.divf %112, %113 : vector<32x16xf32>
    %115 = arith.mulf %101, %114 : vector<32x16xf32>
    %cst_62 = arith.constant 1.000000e+00 : f32
    %116 = vector.broadcast %cst_62 : f32 to vector<32x16xf32>
    %117 = arith.subf %116, %114 : vector<32x16xf32>
    %118 = arith.mulf %91, %117 : vector<32x16xf32>
    %119 = arith.addf %115, %118 : vector<32x16xf32>
    %c0_63 = arith.constant 0 : index
    %c0_64 = arith.constant 0 : index
    %120 = vector.load %arg7[%c0_63, %c0_64] : memref<16x48xf32, #tpu.memory_space<vmem>>, vector<16x48xf32>
    %cst_65 = arith.constant dense<0.000000e+00> : vector<32x48xf32>
    %121 = tpu.matmul %119, %120, %cst_65 {dimension_numbers = #tpu.dot_dimension_numbers<[1], [0], [0], [1], [0, 0, 1, 1], [], []>} : vector<32x16xf32>, vector<16x48xf32>, vector<32x48xf32> -> vector<32x48xf32>
    %c0_66 = arith.constant 0 : index
    %c0_67 = arith.constant 0 : index
    %122 = vector.load %arg8[%c0_66, %c0_67] : memref<1x48xf32, #tpu.memory_space<vmem>>, vector<1x48xf32>
    %123 = vector.broadcast %122 : vector<1x48xf32> to vector<32x48xf32>
    %124 = arith.addf %121, %123 : vector<32x48xf32>
    %c0_68 = arith.constant 0 : index
    %c0_69 = arith.constant 0 : index
    %125 = vector.load %arg9[%c0_68, %c0_69] : memref<32x48xf32, #tpu.memory_space<vmem>>, vector<32x48xf32>
    tpu.vector_store %arg9[%c0_68, %c0_69], %124 {strides = array<i32>} : memref<32x48xf32, #tpu.memory_space<vmem>>, vector<32x48xf32>,
    return
  }
}

module attributes {stable_mosaic.version = 11 : i64} {
  func.func @_bigru_kernel(%arg0: memref<2x1xi32, #tpu.memory_space<vmem>>, %arg1: memref<16x2x48xf32, #tpu.memory_space<vmem>>, %arg2: memref<2x8x24xf32, #tpu.memory_space<vmem>>, %arg3: memref<2x1x24xf32, #tpu.memory_space<vmem>>, %arg4: memref<16x2x16xf32, #tpu.memory_space<vmem>>, %arg5: memref<2x8xf32, #tpu.memory_space<vmem>>, %arg6: memref<2x8xf32, #tpu.memory_space<vmem>>) attributes {dimension_semantics = [], scalar_prefetch = 0 : i64, scratch_operands = 2 : i64, tpu.core_type = #tpu.core_type<tc>} {
    %c0 = arith.constant 0 : index
    %c0_0 = arith.constant 0 : index
    %0 = vector.load %arg0[%c0, %c0_0] : memref<2x1xi32, #tpu.memory_space<vmem>>, vector<2x1xi32>
    %c0_1 = arith.constant 0 : index
    %c0_2 = arith.constant 0 : index
    %c0_3 = arith.constant 0 : index
    %1 = vector.load %arg2[%c0_1, %c0_2, %c0_3] : memref<2x8x24xf32, #tpu.memory_space<vmem>>, vector<1x8x24xf32>
    %2 = vector.shape_cast %1 : vector<1x8x24xf32> to vector<8x24xf32>
    %c1 = arith.constant 1 : index
    %c0_4 = arith.constant 0 : index
    %c0_5 = arith.constant 0 : index
    %3 = vector.load %arg2[%c1, %c0_4, %c0_5] : memref<2x8x24xf32, #tpu.memory_space<vmem>>, vector<1x8x24xf32>
    %4 = vector.shape_cast %3 : vector<1x8x24xf32> to vector<8x24xf32>
    %c0_6 = arith.constant 0 : index
    %c0_7 = arith.constant 0 : index
    %c0_8 = arith.constant 0 : index
    %5 = vector.load %arg3[%c0_6, %c0_7, %c0_8] : memref<2x1x24xf32, #tpu.memory_space<vmem>>, vector<1x1x24xf32>
    %6 = vector.shape_cast %5 : vector<1x1x24xf32> to vector<1x24xf32>
    %c1_9 = arith.constant 1 : index
    %c0_10 = arith.constant 0 : index
    %c0_11 = arith.constant 0 : index
    %7 = vector.load %arg3[%c1_9, %c0_10, %c0_11] : memref<2x1x24xf32, #tpu.memory_space<vmem>>, vector<1x1x24xf32>
    %8 = vector.shape_cast %7 : vector<1x1x24xf32> to vector<1x24xf32>
    %cst = arith.constant 0.000000e+00 : f32
    %9 = vector.broadcast %cst : f32 to vector<2x8xf32>
    %c0_12 = arith.constant 0 : index
    %c0_13 = arith.constant 0 : index
    %10 = vector.load %arg5[%c0_12, %c0_13] : memref<2x8xf32, #tpu.memory_space<vmem>>, vector<2x8xf32>
    tpu.vector_store %arg5[%c0_12, %c0_13], %9 {strides = array<i32>} : memref<2x8xf32, #tpu.memory_space<vmem>>, vector<2x8xf32>,
    %cst_14 = arith.constant 0.000000e+00 : f32
    %11 = vector.broadcast %cst_14 : f32 to vector<2x8xf32>
    %c0_15 = arith.constant 0 : index
    %c0_16 = arith.constant 0 : index
    %12 = vector.load %arg6[%c0_15, %c0_16] : memref<2x8xf32, #tpu.memory_space<vmem>>, vector<2x8xf32>
    tpu.vector_store %arg6[%c0_15, %c0_16], %11 {strides = array<i32>} : memref<2x8xf32, #tpu.memory_space<vmem>>, vector<2x8xf32>,
    %c0_i32 = arith.constant 0 : i32
    %c16_i32 = arith.constant 16 : i32
    %13 = arith.addi %c0_i32, %c16_i32 : i32
    %c1_i32 = arith.constant 1 : i32
    scf.for %arg7 = %c0_i32 to %13 step %c1_i32  : i32 {
      %c1_i32_18 = arith.constant 1 : i32
      %14 = arith.muli %arg7, %c1_i32_18 : i32
      %c0_i32_19 = arith.constant 0 : i32
      %15 = arith.addi %c0_i32_19, %14 : i32
      %16 = arith.index_cast %15 : i32 to index
      %c0_20 = arith.constant 0 : index
      %c0_21 = arith.constant 0 : index
      %17 = vector.load %arg1[%16, %c0_20, %c0_21] : memref<16x2x48xf32, #tpu.memory_space<vmem>>, vector<1x2x48xf32>
      %18 = vector.shape_cast %17 : vector<1x2x48xf32> to vector<2x48xf32>
      %c0_22 = arith.constant 0 : index
      %c0_23 = arith.constant 0 : index
      %19 = vector.load %arg5[%c0_22, %c0_23] : memref<2x8xf32, #tpu.memory_space<vmem>>, vector<2x8xf32>
      %20 = vector.extract_strided_slice %18 {offsets = [0, 0], sizes = [2, 24], strides = [1, 1]} : vector<2x48xf32> to vector<2x24xf32>
      %cst_24 = arith.constant dense<0.000000e+00> : vector<2x24xf32>
      %21 = tpu.matmul %19, %2, %cst_24 {dimension_numbers = #tpu.dot_dimension_numbers<[1], [0], [0], [1], [0, 0, 1, 1], [], []>} : vector<2x8xf32>, vector<8x24xf32>, vector<2x24xf32> -> vector<2x24xf32>
      %22 = vector.broadcast %6 : vector<1x24xf32> to vector<2x24xf32>
      %23 = arith.addf %21, %22 : vector<2x24xf32>
      %24 = vector.extract_strided_slice %20 {offsets = [0, 0], sizes = [2, 8], strides = [1, 1]} : vector<2x24xf32> to vector<2x8xf32>
      %25 = vector.extract_strided_slice %23 {offsets = [0, 0], sizes = [2, 8], strides = [1, 1]} : vector<2x24xf32> to vector<2x8xf32>
      %26 = arith.addf %24, %25 : vector<2x8xf32>
      %27 = arith.negf %26 : vector<2x8xf32>
      %28 = math.exp %27 : vector<2x8xf32>
      %cst_25 = arith.constant 1.000000e+00 : f32
      %29 = vector.broadcast %cst_25 : f32 to vector<2x8xf32>
      %30 = arith.addf %29, %28 : vector<2x8xf32>
      %31 = arith.divf %29, %30 : vector<2x8xf32>
      %32 = vector.extract_strided_slice %20 {offsets = [0, 8], sizes = [2, 8], strides = [1, 1]} : vector<2x24xf32> to vector<2x8xf32>
      %33 = vector.extract_strided_slice %23 {offsets = [0, 8], sizes = [2, 8], strides = [1, 1]} : vector<2x24xf32> to vector<2x8xf32>
      %34 = arith.addf %32, %33 : vector<2x8xf32>
      %35 = arith.negf %34 : vector<2x8xf32>
      %36 = math.exp %35 : vector<2x8xf32>
      %cst_26 = arith.constant 1.000000e+00 : f32
      %37 = vector.broadcast %cst_26 : f32 to vector<2x8xf32>
      %38 = arith.addf %37, %36 : vector<2x8xf32>
      %39 = arith.divf %37, %38 : vector<2x8xf32>
      %40 = vector.extract_strided_slice %20 {offsets = [0, 16], sizes = [2, 8], strides = [1, 1]} : vector<2x24xf32> to vector<2x8xf32>
      %41 = vector.extract_strided_slice %23 {offsets = [0, 16], sizes = [2, 8], strides = [1, 1]} : vector<2x24xf32> to vector<2x8xf32>
      %42 = arith.mulf %31, %41 : vector<2x8xf32>
      %43 = arith.addf %40, %42 : vector<2x8xf32>
      %44 = math.tanh %43 : vector<2x8xf32>
      %cst_27 = arith.constant 1.000000e+00 : f32
      %45 = vector.broadcast %cst_27 : f32 to vector<2x8xf32>
      %46 = arith.subf %45, %39 : vector<2x8xf32>
      %47 = arith.mulf %46, %44 : vector<2x8xf32>
      %48 = arith.mulf %39, %19 : vector<2x8xf32>
      %49 = arith.addf %47, %48 : vector<2x8xf32>
      %50 = vector.broadcast %15 : i32 to vector<2x1xi32>
      %51 = arith.cmpi sgt, %0, %50 : vector<2x1xi32>
      %52 = vector.shape_cast %51 : vector<2x1xi1> to vector<2x1xi1>
      %53 = vector.broadcast %52 : vector<2x1xi1> to vector<2x8xi1>
      %54 = arith.select %53, %49, %19 : vector<2x8xi1>, vector<2x8xf32>
      %c0_28 = arith.constant 0 : index
      %c0_29 = arith.constant 0 : index
      %55 = vector.load %arg5[%c0_28, %c0_29] : memref<2x8xf32, #tpu.memory_space<vmem>>, vector<2x8xf32>
      tpu.vector_store %arg5[%c0_28, %c0_29], %54 {strides = array<i32>} : memref<2x8xf32, #tpu.memory_space<vmem>>, vector<2x8xf32>,
      %cst_30 = arith.constant 0.000000e+00 : f32
      %56 = vector.shape_cast %51 : vector<2x1xi1> to vector<2x1xi1>
      %57 = vector.broadcast %56 : vector<2x1xi1> to vector<2x8xi1>
      %58 = vector.broadcast %cst_30 : f32 to vector<2x8xf32>
      %59 = arith.select %57, %49, %58 : vector<2x8xi1>, vector<2x8xf32>
      %60 = arith.index_cast %15 : i32 to index
      %c0_31 = arith.constant 0 : index
      %c0_32 = arith.constant 0 : index
      %61 = vector.load %arg4[%60, %c0_31, %c0_32] : memref<16x2x16xf32, #tpu.memory_space<vmem>>, vector<1x2x8xf32>
      %62 = vector.shape_cast %61 : vector<1x2x8xf32> to vector<2x8xf32>
      %63 = vector.shape_cast %59 : vector<2x8xf32> to vector<1x2x8xf32>
      tpu.vector_store %arg4[%60, %c0_31, %c0_32], %63 {strides = array<i32>} : memref<16x2x16xf32, #tpu.memory_space<vmem>>, vector<1x2x8xf32>,
      %c15_i32 = arith.constant 15 : i32
      %64 = arith.subi %c15_i32, %15 : i32
      %65 = arith.index_cast %64 : i32 to index
      %c0_33 = arith.constant 0 : index
      %c0_34 = arith.constant 0 : index
      %66 = vector.load %arg1[%65, %c0_33, %c0_34] : memref<16x2x48xf32, #tpu.memory_space<vmem>>, vector<1x2x48xf32>
      %67 = vector.shape_cast %66 : vector<1x2x48xf32> to vector<2x48xf32>
      %c0_35 = arith.constant 0 : index
      %c0_36 = arith.constant 0 : index
      %68 = vector.load %arg6[%c0_35, %c0_36] : memref<2x8xf32, #tpu.memory_space<vmem>>, vector<2x8xf32>
      %69 = vector.extract_strided_slice %67 {offsets = [0, 24], sizes = [2, 24], strides = [1, 1]} : vector<2x48xf32> to vector<2x24xf32>
      %cst_37 = arith.constant dense<0.000000e+00> : vector<2x24xf32>
      %70 = tpu.matmul %68, %4, %cst_37 {dimension_numbers = #tpu.dot_dimension_numbers<[1], [0], [0], [1], [0, 0, 1, 1], [], []>} : vector<2x8xf32>, vector<8x24xf32>, vector<2x24xf32> -> vector<2x24xf32>
      %71 = vector.broadcast %8 : vector<1x24xf32> to vector<2x24xf32>
      %72 = arith.addf %70, %71 : vector<2x24xf32>
      %73 = vector.extract_strided_slice %69 {offsets = [0, 0], sizes = [2, 8], strides = [1, 1]} : vector<2x24xf32> to vector<2x8xf32>
      %74 = vector.extract_strided_slice %72 {offsets = [0, 0], sizes = [2, 8], strides = [1, 1]} : vector<2x24xf32> to vector<2x8xf32>
      %75 = arith.addf %73, %74 : vector<2x8xf32>
      %76 = arith.negf %75 : vector<2x8xf32>
      %77 = math.exp %76 : vector<2x8xf32>
      %cst_38 = arith.constant 1.000000e+00 : f32
      %78 = vector.broadcast %cst_38 : f32 to vector<2x8xf32>
      %79 = arith.addf %78, %77 : vector<2x8xf32>
      %80 = arith.divf %78, %79 : vector<2x8xf32>
      %81 = vector.extract_strided_slice %69 {offsets = [0, 8], sizes = [2, 8], strides = [1, 1]} : vector<2x24xf32> to vector<2x8xf32>
      %82 = vector.extract_strided_slice %72 {offsets = [0, 8], sizes = [2, 8], strides = [1, 1]} : vector<2x24xf32> to vector<2x8xf32>
      %83 = arith.addf %81, %82 : vector<2x8xf32>
      %84 = arith.negf %83 : vector<2x8xf32>
      %85 = math.exp %84 : vector<2x8xf32>
      %cst_39 = arith.constant 1.000000e+00 : f32
      %86 = vector.broadcast %cst_39 : f32 to vector<2x8xf32>
      %87 = arith.addf %86, %85 : vector<2x8xf32>
      %88 = arith.divf %86, %87 : vector<2x8xf32>
      %89 = vector.extract_strided_slice %69 {offsets = [0, 16], sizes = [2, 8], strides = [1, 1]} : vector<2x24xf32> to vector<2x8xf32>
      %90 = vector.extract_strided_slice %72 {offsets = [0, 16], sizes = [2, 8], strides = [1, 1]} : vector<2x24xf32> to vector<2x8xf32>
      %91 = arith.mulf %80, %90 : vector<2x8xf32>
      %92 = arith.addf %89, %91 : vector<2x8xf32>
      %93 = math.tanh %92 : vector<2x8xf32>
      %cst_40 = arith.constant 1.000000e+00 : f32
      %94 = vector.broadcast %cst_40 : f32 to vector<2x8xf32>
      %95 = arith.subf %94, %88 : vector<2x8xf32>
      %96 = arith.mulf %95, %93 : vector<2x8xf32>
      %97 = arith.mulf %88, %68 : vector<2x8xf32>
      %98 = arith.addf %96, %97 : vector<2x8xf32>
      %99 = vector.broadcast %64 : i32 to vector<2x1xi32>
      %100 = arith.cmpi sgt, %0, %99 : vector<2x1xi32>
      %101 = vector.shape_cast %100 : vector<2x1xi1> to vector<2x1xi1>
      %102 = vector.broadcast %101 : vector<2x1xi1> to vector<2x8xi1>
      %103 = arith.select %102, %98, %68 : vector<2x8xi1>, vector<2x8xf32>
      %c0_41 = arith.constant 0 : index
      %c0_42 = arith.constant 0 : index
      %104 = vector.load %arg6[%c0_41, %c0_42] : memref<2x8xf32, #tpu.memory_space<vmem>>, vector<2x8xf32>
      tpu.vector_store %arg6[%c0_41, %c0_42], %103 {strides = array<i32>} : memref<2x8xf32, #tpu.memory_space<vmem>>, vector<2x8xf32>,
      %cst_43 = arith.constant 0.000000e+00 : f32
      %105 = vector.shape_cast %100 : vector<2x1xi1> to vector<2x1xi1>
      %106 = vector.broadcast %105 : vector<2x1xi1> to vector<2x8xi1>
      %107 = vector.broadcast %cst_43 : f32 to vector<2x8xf32>
      %108 = arith.select %106, %98, %107 : vector<2x8xi1>, vector<2x8xf32>
      %109 = arith.index_cast %64 : i32 to index
      %c0_44 = arith.constant 0 : index
      %c8 = arith.constant 8 : index
      %110 = vector.load %arg4[%109, %c0_44, %c8] : memref<16x2x16xf32, #tpu.memory_space<vmem>>, vector<1x2x8xf32>
      %111 = vector.shape_cast %110 : vector<1x2x8xf32> to vector<2x8xf32>
      %112 = vector.shape_cast %108 : vector<2x8xf32> to vector<1x2x8xf32>
      tpu.vector_store %arg4[%109, %c0_44, %c8], %112 {strides = array<i32>} : memref<16x2x16xf32, #tpu.memory_space<vmem>>, vector<1x2x8xf32>,
    }
    %c16_i32_17 = arith.constant 16 : i32
    return
  }
}

module attributes {stable_mosaic.version = 11 : i64} {
  func.func @_frontend_kernel(%arg0: i32, %arg1: memref<1x19x8xf32, #tpu.memory_space<vmem>>, %arg2: memref<4x8x32xf32, #tpu.memory_space<vmem>>, %arg3: memref<1x32xf32, #tpu.memory_space<vmem>>, %arg4: memref<3x32x16xf32, #tpu.memory_space<vmem>>, %arg5: memref<1x16xf32, #tpu.memory_space<vmem>>, %arg6: memref<3x16x8xf32, #tpu.memory_space<vmem>>, %arg7: memref<1x8xf32, #tpu.memory_space<vmem>>, %arg8: memref<1x16x8xf32, #tpu.memory_space<vmem>>, %arg9: memref<17x32xf32, #tpu.memory_space<vmem>>, %arg10: memref<18x32xf32, #tpu.memory_space<vmem>>, %arg11: memref<18x16xf32, #tpu.memory_space<vmem>>) attributes {dimension_semantics = [#tpu.dimension_semantics<parallel>], iteration_bounds = array<i64: 2>, scalar_prefetch = 0 : i64, scratch_operands = 3 : i64, tpu.core_type = #tpu.core_type<tc>, window_params = [{transform_indices = @transform_0, window_bounds = array<i64: 1, 19, 8>}, {pipeline_mode = #tpu.pipeline_mode<synchronous>, transform_indices = @transform_1, window_bounds = array<i64: 4, 8, 32>}, {pipeline_mode = #tpu.pipeline_mode<synchronous>, transform_indices = @transform_2, window_bounds = array<i64: 1, 32>}, {pipeline_mode = #tpu.pipeline_mode<synchronous>, transform_indices = @transform_3, window_bounds = array<i64: 3, 32, 16>}, {pipeline_mode = #tpu.pipeline_mode<synchronous>, transform_indices = @transform_4, window_bounds = array<i64: 1, 16>}, {pipeline_mode = #tpu.pipeline_mode<synchronous>, transform_indices = @transform_5, window_bounds = array<i64: 3, 16, 8>}, {pipeline_mode = #tpu.pipeline_mode<synchronous>, transform_indices = @transform_6, window_bounds = array<i64: 1, 8>}, {transform_indices = @transform_7, window_bounds = array<i64: 1, 16, 8>}]} {
    %c0 = arith.constant 0 : index
    %c0_0 = arith.constant 0 : index
    %c0_1 = arith.constant 0 : index
    %0 = vector.load %arg1[%c0, %c0_0, %c0_1] : memref<1x19x8xf32, #tpu.memory_space<vmem>>, vector<1x19x8xf32>
    %1 = vector.shape_cast %0 : vector<1x19x8xf32> to vector<19x8xf32>
    %cst = arith.constant 0.000000e+00 : f32
    %2 = vector.broadcast %cst : f32 to vector<16x32xf32>
    %3 = vector.extract_strided_slice %1 {offsets = [0, 0], sizes = [16, 8], strides = [1, 1]} : vector<19x8xf32> to vector<16x8xf32>
    %c0_2 = arith.constant 0 : index
    %c0_3 = arith.constant 0 : index
    %c0_4 = arith.constant 0 : index
    %4 = vector.load %arg2[%c0_2, %c0_3, %c0_4] : memref<4x8x32xf32, #tpu.memory_space<vmem>>, vector<1x8x32xf32>
    %5 = vector.shape_cast %4 : vector<1x8x32xf32> to vector<8x32xf32>
    %cst_5 = arith.constant dense<0.000000e+00> : vector<16x32xf32>
    %6 = tpu.matmul %3, %5, %cst_5 {dimension_numbers = #tpu.dot_dimension_numbers<[1], [0], [0], [1], [0, 0, 1, 1], [], []>} : vector<16x8xf32>, vector<8x32xf32>, vector<16x32xf32> -> vector<16x32xf32>
    %7 = arith.addf %2, %6 : vector<16x32xf32>
    %8 = vector.extract_strided_slice %1 {offsets = [1, 0], sizes = [16, 8], strides = [1, 1]} : vector<19x8xf32> to vector<16x8xf32>
    %c1 = arith.constant 1 : index
    %c0_6 = arith.constant 0 : index
    %c0_7 = arith.constant 0 : index
    %9 = vector.load %arg2[%c1, %c0_6, %c0_7] : memref<4x8x32xf32, #tpu.memory_space<vmem>>, vector<1x8x32xf32>
    %10 = vector.shape_cast %9 : vector<1x8x32xf32> to vector<8x32xf32>
    %cst_8 = arith.constant dense<0.000000e+00> : vector<16x32xf32>
    %11 = tpu.matmul %8, %10, %cst_8 {dimension_numbers = #tpu.dot_dimension_numbers<[1], [0], [0], [1], [0, 0, 1, 1], [], []>} : vector<16x8xf32>, vector<8x32xf32>, vector<16x32xf32> -> vector<16x32xf32>
    %12 = arith.addf %7, %11 : vector<16x32xf32>
    %13 = vector.extract_strided_slice %1 {offsets = [2, 0], sizes = [16, 8], strides = [1, 1]} : vector<19x8xf32> to vector<16x8xf32>
    %c2 = arith.constant 2 : index
    %c0_9 = arith.constant 0 : index
    %c0_10 = arith.constant 0 : index
    %14 = vector.load %arg2[%c2, %c0_9, %c0_10] : memref<4x8x32xf32, #tpu.memory_space<vmem>>, vector<1x8x32xf32>
    %15 = vector.shape_cast %14 : vector<1x8x32xf32> to vector<8x32xf32>
    %cst_11 = arith.constant dense<0.000000e+00> : vector<16x32xf32>
    %16 = tpu.matmul %13, %15, %cst_11 {dimension_numbers = #tpu.dot_dimension_numbers<[1], [0], [0], [1], [0, 0, 1, 1], [], []>} : vector<16x8xf32>, vector<8x32xf32>, vector<16x32xf32> -> vector<16x32xf32>
    %17 = arith.addf %12, %16 : vector<16x32xf32>
    %18 = vector.extract_strided_slice %1 {offsets = [3, 0], sizes = [16, 8], strides = [1, 1]} : vector<19x8xf32> to vector<16x8xf32>
    %c3 = arith.constant 3 : index
    %c0_12 = arith.constant 0 : index
    %c0_13 = arith.constant 0 : index
    %19 = vector.load %arg2[%c3, %c0_12, %c0_13] : memref<4x8x32xf32, #tpu.memory_space<vmem>>, vector<1x8x32xf32>
    %20 = vector.shape_cast %19 : vector<1x8x32xf32> to vector<8x32xf32>
    %cst_14 = arith.constant dense<0.000000e+00> : vector<16x32xf32>
    %21 = tpu.matmul %18, %20, %cst_14 {dimension_numbers = #tpu.dot_dimension_numbers<[1], [0], [0], [1], [0, 0, 1, 1], [], []>} : vector<16x8xf32>, vector<8x32xf32>, vector<16x32xf32> -> vector<16x32xf32>
    %22 = arith.addf %17, %21 : vector<16x32xf32>
    %c0_15 = arith.constant 0 : index
    %c0_16 = arith.constant 0 : index
    %23 = vector.load %arg3[%c0_15, %c0_16] : memref<1x32xf32, #tpu.memory_space<vmem>>, vector<1x32xf32>
    %24 = vector.broadcast %23 : vector<1x32xf32> to vector<16x32xf32>
    %25 = arith.addf %22, %24 : vector<16x32xf32>
    %cst_17 = arith.constant 0.000000e+00 : f32
    %26 = vector.broadcast %cst_17 : f32 to vector<16x32xf32>
    %27 = arith.maximumf %25, %26 : vector<16x32xf32>
    %c0_18 = arith.constant 0 : index
    %c0_19 = arith.constant 0 : index
    %28 = vector.load %arg9[%c0_18, %c0_19] : memref<17x32xf32, #tpu.memory_space<vmem>>, vector<16x32xf32>
    tpu.vector_store %arg9[%c0_18, %c0_19], %27 {strides = array<i32>} : memref<17x32xf32, #tpu.memory_space<vmem>>, vector<16x32xf32>,
    %cst_20 = arith.constant 0.000000e+00 : f32
    %29 = vector.broadcast %cst_20 : f32 to vector<1x32xf32>
    %c16 = arith.constant 16 : index
    %c0_21 = arith.constant 0 : index
    %30 = vector.load %arg9[%c16, %c0_21] : memref<17x32xf32, #tpu.memory_space<vmem>>, vector<1x32xf32>
    tpu.vector_store %arg9[%c16, %c0_21], %29 {strides = array<i32>} : memref<17x32xf32, #tpu.memory_space<vmem>>, vector<1x32xf32>,
    %c0_22 = arith.constant 0 : index
    %c0_23 = arith.constant 0 : index
    %31 = vector.load %arg9[%c0_22, %c0_23] : memref<17x32xf32, #tpu.memory_space<vmem>>, vector<16x32xf32>
    %c1_24 = arith.constant 1 : index
    %c0_25 = arith.constant 0 : index
    %32 = vector.load %arg9[%c1_24, %c0_25] : memref<17x32xf32, #tpu.memory_space<vmem>>, vector<16x32xf32>
    %33 = arith.maximumf %31, %32 : vector<16x32xf32>
    %cst_26 = arith.constant 0.000000e+00 : f32
    %34 = vector.broadcast %cst_26 : f32 to vector<18x32xf32>
    %c0_27 = arith.constant 0 : index
    %c0_28 = arith.constant 0 : index
    %35 = vector.load %arg10[%c0_27, %c0_28] : memref<18x32xf32, #tpu.memory_space<vmem>>, vector<18x32xf32>
    tpu.vector_store %arg10[%c0_27, %c0_28], %34 {strides = array<i32>} : memref<18x32xf32, #tpu.memory_space<vmem>>, vector<18x32xf32>,
    %c1_29 = arith.constant 1 : index
    %c0_30 = arith.constant 0 : index
    %36 = vector.load %arg10[%c1_29, %c0_30] : memref<18x32xf32, #tpu.memory_space<vmem>>, vector<16x32xf32>
    tpu.vector_store %arg10[%c1_29, %c0_30], %33 {strides = array<i32>} : memref<18x32xf32, #tpu.memory_space<vmem>>, vector<16x32xf32>,
    %cst_31 = arith.constant 0.000000e+00 : f32
    %37 = vector.broadcast %cst_31 : f32 to vector<16x16xf32>
    %c0_32 = arith.constant 0 : index
    %c0_33 = arith.constant 0 : index
    %38 = vector.load %arg10[%c0_32, %c0_33] : memref<18x32xf32, #tpu.memory_space<vmem>>, vector<16x32xf32>
    %c0_34 = arith.constant 0 : index
    %c0_35 = arith.constant 0 : index
    %c0_36 = arith.constant 0 : index
    %39 = vector.load %arg4[%c0_34, %c0_35, %c0_36] : memref<3x32x16xf32, #tpu.memory_space<vmem>>, vector<1x32x16xf32>
    %40 = vector.shape_cast %39 : vector<1x32x16xf32> to vector<32x16xf32>
    %cst_37 = arith.constant dense<0.000000e+00> : vector<16x16xf32>
    %41 = tpu.matmul %38, %40, %cst_37 {dimension_numbers = #tpu.dot_dimension_numbers<[1], [0], [0], [1], [0, 0, 1, 1], [], []>} : vector<16x32xf32>, vector<32x16xf32>, vector<16x16xf32> -> vector<16x16xf32>
    %42 = arith.addf %37, %41 : vector<16x16xf32>
    %c1_38 = arith.constant 1 : index
    %c0_39 = arith.constant 0 : index
    %43 = vector.load %arg10[%c1_38, %c0_39] : memref<18x32xf32, #tpu.memory_space<vmem>>, vector<16x32xf32>
    %c1_40 = arith.constant 1 : index
    %c0_41 = arith.constant 0 : index
    %c0_42 = arith.constant 0 : index
    %44 = vector.load %arg4[%c1_40, %c0_41, %c0_42] : memref<3x32x16xf32, #tpu.memory_space<vmem>>, vector<1x32x16xf32>
    %45 = vector.shape_cast %44 : vector<1x32x16xf32> to vector<32x16xf32>
    %cst_43 = arith.constant dense<0.000000e+00> : vector<16x16xf32>
    %46 = tpu.matmul %43, %45, %cst_43 {dimension_numbers = #tpu.dot_dimension_numbers<[1], [0], [0], [1], [0, 0, 1, 1], [], []>} : vector<16x32xf32>, vector<32x16xf32>, vector<16x16xf32> -> vector<16x16xf32>
    %47 = arith.addf %42, %46 : vector<16x16xf32>
    %c2_44 = arith.constant 2 : index
    %c0_45 = arith.constant 0 : index
    %48 = vector.load %arg10[%c2_44, %c0_45] : memref<18x32xf32, #tpu.memory_space<vmem>>, vector<16x32xf32>
    %c2_46 = arith.constant 2 : index
    %c0_47 = arith.constant 0 : index
    %c0_48 = arith.constant 0 : index
    %49 = vector.load %arg4[%c2_46, %c0_47, %c0_48] : memref<3x32x16xf32, #tpu.memory_space<vmem>>, vector<1x32x16xf32>
    %50 = vector.shape_cast %49 : vector<1x32x16xf32> to vector<32x16xf32>
    %cst_49 = arith.constant dense<0.000000e+00> : vector<16x16xf32>
    %51 = tpu.matmul %48, %50, %cst_49 {dimension_numbers = #tpu.dot_dimension_numbers<[1], [0], [0], [1], [0, 0, 1, 1], [], []>} : vector<16x32xf32>, vector<32x16xf32>, vector<16x16xf32> -> vector<16x16xf32>
    %52 = arith.addf %47, %51 : vector<16x16xf32>
    %c0_50 = arith.constant 0 : index
    %c0_51 = arith.constant 0 : index
    %53 = vector.load %arg5[%c0_50, %c0_51] : memref<1x16xf32, #tpu.memory_space<vmem>>, vector<1x16xf32>
    %54 = vector.broadcast %53 : vector<1x16xf32> to vector<16x16xf32>
    %55 = arith.addf %52, %54 : vector<16x16xf32>
    %cst_52 = arith.constant 0.000000e+00 : f32
    %56 = vector.broadcast %cst_52 : f32 to vector<16x16xf32>
    %57 = arith.maximumf %55, %56 : vector<16x16xf32>
    %cst_53 = arith.constant 0.000000e+00 : f32
    %58 = vector.broadcast %cst_53 : f32 to vector<18x16xf32>
    %c0_54 = arith.constant 0 : index
    %c0_55 = arith.constant 0 : index
    %59 = vector.load %arg11[%c0_54, %c0_55] : memref<18x16xf32, #tpu.memory_space<vmem>>, vector<18x16xf32>
    tpu.vector_store %arg11[%c0_54, %c0_55], %58 {strides = array<i32>} : memref<18x16xf32, #tpu.memory_space<vmem>>, vector<18x16xf32>,
    %c1_56 = arith.constant 1 : index
    %c0_57 = arith.constant 0 : index
    %60 = vector.load %arg11[%c1_56, %c0_57] : memref<18x16xf32, #tpu.memory_space<vmem>>, vector<16x16xf32>
    tpu.vector_store %arg11[%c1_56, %c0_57], %57 {strides = array<i32>} : memref<18x16xf32, #tpu.memory_space<vmem>>, vector<16x16xf32>,
    %cst_58 = arith.constant 0.000000e+00 : f32
    %61 = vector.broadcast %cst_58 : f32 to vector<16x8xf32>
    %c0_59 = arith.constant 0 : index
    %c0_60 = arith.constant 0 : index
    %62 = vector.load %arg11[%c0_59, %c0_60] : memref<18x16xf32, #tpu.memory_space<vmem>>, vector<16x16xf32>
    %c0_61 = arith.constant 0 : index
    %c0_62 = arith.constant 0 : index
    %c0_63 = arith.constant 0 : index
    %63 = vector.load %arg6[%c0_61, %c0_62, %c0_63] : memref<3x16x8xf32, #tpu.memory_space<vmem>>, vector<1x16x8xf32>
    %64 = vector.shape_cast %63 : vector<1x16x8xf32> to vector<16x8xf32>
    %cst_64 = arith.constant dense<0.000000e+00> : vector<16x8xf32>
    %65 = tpu.matmul %62, %64, %cst_64 {dimension_numbers = #tpu.dot_dimension_numbers<[1], [0], [0], [1], [0, 0, 1, 1], [], []>} : vector<16x16xf32>, vector<16x8xf32>, vector<16x8xf32> -> vector<16x8xf32>
    %66 = arith.addf %61, %65 : vector<16x8xf32>
    %c1_65 = arith.constant 1 : index
    %c0_66 = arith.constant 0 : index
    %67 = vector.load %arg11[%c1_65, %c0_66] : memref<18x16xf32, #tpu.memory_space<vmem>>, vector<16x16xf32>
    %c1_67 = arith.constant 1 : index
    %c0_68 = arith.constant 0 : index
    %c0_69 = arith.constant 0 : index
    %68 = vector.load %arg6[%c1_67, %c0_68, %c0_69] : memref<3x16x8xf32, #tpu.memory_space<vmem>>, vector<1x16x8xf32>
    %69 = vector.shape_cast %68 : vector<1x16x8xf32> to vector<16x8xf32>
    %cst_70 = arith.constant dense<0.000000e+00> : vector<16x8xf32>
    %70 = tpu.matmul %67, %69, %cst_70 {dimension_numbers = #tpu.dot_dimension_numbers<[1], [0], [0], [1], [0, 0, 1, 1], [], []>} : vector<16x16xf32>, vector<16x8xf32>, vector<16x8xf32> -> vector<16x8xf32>
    %71 = arith.addf %66, %70 : vector<16x8xf32>
    %c2_71 = arith.constant 2 : index
    %c0_72 = arith.constant 0 : index
    %72 = vector.load %arg11[%c2_71, %c0_72] : memref<18x16xf32, #tpu.memory_space<vmem>>, vector<16x16xf32>
    %c2_73 = arith.constant 2 : index
    %c0_74 = arith.constant 0 : index
    %c0_75 = arith.constant 0 : index
    %73 = vector.load %arg6[%c2_73, %c0_74, %c0_75] : memref<3x16x8xf32, #tpu.memory_space<vmem>>, vector<1x16x8xf32>
    %74 = vector.shape_cast %73 : vector<1x16x8xf32> to vector<16x8xf32>
    %cst_76 = arith.constant dense<0.000000e+00> : vector<16x8xf32>
    %75 = tpu.matmul %72, %74, %cst_76 {dimension_numbers = #tpu.dot_dimension_numbers<[1], [0], [0], [1], [0, 0, 1, 1], [], []>} : vector<16x16xf32>, vector<16x8xf32>, vector<16x8xf32> -> vector<16x8xf32>
    %76 = arith.addf %71, %75 : vector<16x8xf32>
    %77 = vector.extract_strided_slice %1 {offsets = [1, 0], sizes = [16, 8], strides = [1, 1]} : vector<19x8xf32> to vector<16x8xf32>
    %c0_77 = arith.constant 0 : index
    %c0_78 = arith.constant 0 : index
    %78 = vector.load %arg7[%c0_77, %c0_78] : memref<1x8xf32, #tpu.memory_space<vmem>>, vector<1x8xf32>
    %79 = vector.broadcast %78 : vector<1x8xf32> to vector<16x8xf32>
    %80 = arith.addf %76, %79 : vector<16x8xf32>
    %81 = arith.addf %80, %77 : vector<16x8xf32>
    %c0_79 = arith.constant 0 : index
    %c0_80 = arith.constant 0 : index
    %c0_81 = arith.constant 0 : index
    %82 = vector.load %arg8[%c0_79, %c0_80, %c0_81] : memref<1x16x8xf32, #tpu.memory_space<vmem>>, vector<1x16x8xf32>
    %83 = vector.shape_cast %82 : vector<1x16x8xf32> to vector<16x8xf32>
    %84 = vector.shape_cast %81 : vector<16x8xf32> to vector<1x16x8xf32>
    tpu.vector_store %arg8[%c0_79, %c0_80, %c0_81], %84 {strides = array<i32>} : memref<1x16x8xf32, #tpu.memory_space<vmem>>, vector<1x16x8xf32>,
    return
  }
  func.func @transform_0(%arg0: i32) -> (i32, i32, i32) {
    %c0_i32 = arith.constant 0 : i32
    %c0_i32_0 = arith.constant 0 : i32
    %c0_i32_1 = arith.constant 0 : i32
    return %arg0, %c0_i32, %c0_i32_0 : i32, i32, i32
  }
  func.func @transform_1(%arg0: i32) -> (i32, i32, i32) {
    %c0_i32 = arith.constant 0 : i32
    %c0_i32_0 = arith.constant 0 : i32
    %c0_i32_1 = arith.constant 0 : i32
    %c0_i32_2 = arith.constant 0 : i32
    return %c0_i32, %c0_i32_0, %c0_i32_1 : i32, i32, i32
  }
  func.func @transform_2(%arg0: i32) -> (i32, i32) {
    %c0_i32 = arith.constant 0 : i32
    %c0_i32_0 = arith.constant 0 : i32
    %c0_i32_1 = arith.constant 0 : i32
    return %c0_i32, %c0_i32_0 : i32, i32
  }
  func.func @transform_3(%arg0: i32) -> (i32, i32, i32) {
    %c0_i32 = arith.constant 0 : i32
    %c0_i32_0 = arith.constant 0 : i32
    %c0_i32_1 = arith.constant 0 : i32
    %c0_i32_2 = arith.constant 0 : i32
    return %c0_i32, %c0_i32_0, %c0_i32_1 : i32, i32, i32
  }
  func.func @transform_4(%arg0: i32) -> (i32, i32) {
    %c0_i32 = arith.constant 0 : i32
    %c0_i32_0 = arith.constant 0 : i32
    %c0_i32_1 = arith.constant 0 : i32
    return %c0_i32, %c0_i32_0 : i32, i32
  }
  func.func @transform_5(%arg0: i32) -> (i32, i32, i32) {
    %c0_i32 = arith.constant 0 : i32
    %c0_i32_0 = arith.constant 0 : i32
    %c0_i32_1 = arith.constant 0 : i32
    %c0_i32_2 = arith.constant 0 : i32
    return %c0_i32, %c0_i32_0, %c0_i32_1 : i32, i32, i32
  }
  func.func @transform_6(%arg0: i32) -> (i32, i32) {
    %c0_i32 = arith.constant 0 : i32
    %c0_i32_0 = arith.constant 0 : i32
    %c0_i32_1 = arith.constant 0 : i32
    return %c0_i32, %c0_i32_0 : i32, i32
  }
  func.func @transform_7(%arg0: i32) -> (i32, i32, i32) {
    %c0_i32 = arith.constant 0 : i32
    %c0_i32_0 = arith.constant 0 : i32
    %c0_i32_1 = arith.constant 0 : i32
    return %arg0, %c0_i32, %c0_i32_0 : i32, i32, i32
  }
}

module attributes {stable_mosaic.version = 11 : i64} {
  func.func @_linear_kernel(%arg0: memref<32x16xf32, #tpu.memory_space<vmem>>, %arg1: memref<16x8xf32, #tpu.memory_space<vmem>>, %arg2: memref<1x8xf32, #tpu.memory_space<vmem>>, %arg3: memref<32x8xf32, #tpu.memory_space<vmem>>) attributes {dimension_semantics = [], scalar_prefetch = 0 : i64, scratch_operands = 0 : i64, tpu.core_type = #tpu.core_type<tc>} {
    %c0 = arith.constant 0 : index
    %c0_0 = arith.constant 0 : index
    %0 = vector.load %arg0[%c0, %c0_0] : memref<32x16xf32, #tpu.memory_space<vmem>>, vector<32x16xf32>
    %c0_1 = arith.constant 0 : index
    %c0_2 = arith.constant 0 : index
    %1 = vector.load %arg1[%c0_1, %c0_2] : memref<16x8xf32, #tpu.memory_space<vmem>>, vector<16x8xf32>
    %cst = arith.constant dense<0.000000e+00> : vector<32x8xf32>
    %2 = tpu.matmul %0, %1, %cst {dimension_numbers = #tpu.dot_dimension_numbers<[1], [0], [0], [1], [0, 0, 1, 1], [], []>} : vector<32x16xf32>, vector<16x8xf32>, vector<32x8xf32> -> vector<32x8xf32>
    %c0_3 = arith.constant 0 : index
    %c0_4 = arith.constant 0 : index
    %3 = vector.load %arg2[%c0_3, %c0_4] : memref<1x8xf32, #tpu.memory_space<vmem>>, vector<1x8xf32>
    %4 = vector.broadcast %3 : vector<1x8xf32> to vector<32x8xf32>
    %5 = arith.addf %2, %4 : vector<32x8xf32>
    %c0_5 = arith.constant 0 : index
    %c0_6 = arith.constant 0 : index
    %6 = vector.load %arg3[%c0_5, %c0_6] : memref<32x8xf32, #tpu.memory_space<vmem>>, vector<32x8xf32>
    tpu.vector_store %arg3[%c0_5, %c0_6], %5 {strides = array<i32>} : memref<32x8xf32, #tpu.memory_space<vmem>>, vector<32x8xf32>,
    return
  }
}

</mosaic_0001>

<bundles_post_ra>
// kernel: postnet_cbhg_forward.7
= control target key start
LH: loop header
LB: loop body
LE: loop exit
PB: predicated region body
PF: predicated region fallthrough
CT: control target
= control target key end

     0   :  { %vm24_vm0 = vcmask 130048   ;;  %vm66_vm1 = vcmask 64512   ;;  %s139_s1 = inlined_call_operand.vmem [shape: f32[16,8], index: 1, kind: input, shape index: {}]   ;;  %s140_s0 = inlined_call_operand.vmem [shape: f32[32,16], index: 0, kind: input, shape index: {}]   ;;  %s141_s2 = inlined_call_operand.vmem [shape: f32[1,8], index: 2, kind: input, shape index: {}]   ;;  %s142_s3 = inlined_call_operand.vmem [shape: f32[32,8], index: 3, kind: output, shape index: {}]  }
   0x1   :  { %v19_v0 = vld [vmem:[%s139_s1 + $0x8] sm:$0xff]  ;;  %v18_v1 = vld [vmem:[%s139_s1] sm:$0xff]  ;;  %v16_v2 = vld [vmem:[%s140_s0 + $0x10] sm:$0xff] }
   0x2   :  { %80 = vmatpush.msra.mxu2 %v19_v0  ;;  %81 = vmatpush.msra.mxu3 %v19_v0  ;;  %v17_v3 = vld [vmem:[%s140_s0 + $0x18] sm:$0xff]  ;;  %v14_v4 = vld [vmem:[%s140_s0] sm:$0xff]  ;;  %v15_v5 = vld [vmem:[%s140_s0 + $0x8] sm:$0xff] }
   0x3   :  { %51 = vmatpush.msra.mxu0 %v19_v0  ;;  %79 = vmatpush.msra.mxu1 %v19_v0  ;;  %v85_v6 = vld [vmem:[%s141_s2] ss:$0 sm:$0xff] }
   0x4   :  { %83 = vmatpush.msra.mxu2 %v18_v1  ;;  %84 = vmatpush.msra.mxu3 %v18_v1 }
   0x5   :  { %77 = vmatmul.msk.f32.vlgmr.msra.gmra.mxu2 %vm24_vm0, %v16_v2  ;;  %78 = vmatmul.msk.f32.vlgmr.msra.gmra.mxu3 %vm24_vm0, %v17_v3 }
   0x6   :  { %52 = vmatpush.msra.mxu0 %v18_v1  ;;  %82 = vmatpush.msra.mxu1 %v18_v1 }
   0x7   :  { %75 = vmatmul.msk.f32.vlgmr.msra.gmra.mxu0 %vm24_vm0, %v14_v4  ;;  %76 = vmatmul.msk.f32.vlgmr.msra.gmra.mxu1 %vm24_vm0, %v15_v5 }
  0x84   :  { %v54_v7 = vpop.f32.mrf.mxu0  ;;  %v57_v8 = vpop.f32.mrf.mxu1 }
  0x85   :  { %v55_v9 = vadd.f32 %v85_v6, %v54_v7  ;;  %v58_v10 = vadd.f32 %v85_v6, %v57_v8 }
  0x87   :  { %67 = vst.msk [vmem:[%s142_s3] sm:$0xff] %vm66_vm1, %v55_v9 }
  0x88   :  { %68 = vst.msk [vmem:[%s142_s3 + $0x8] sm:$0xff] %vm66_vm1, %v58_v10  ;;  %v60_v11 = vpop.f32.mrf.mxu2  ;;  %v63_v12 = vpop.f32.mrf.mxu3 }
  0x89   :  { %v61_v13 = vadd.f32 %v85_v6, %v60_v11  ;;  %v64_v14 = vadd.f32 %v85_v6, %v63_v12 }
  0x8b   :  { %69 = vst.msk [vmem:[%s142_s3 + $0x10] sm:$0xff] %vm66_vm1, %v61_v13 }
  0x8c   :  { %70 = vst.msk [vmem:[%s142_s3 + $0x18] sm:$0xff] %vm66_vm1, %v64_v14 }

// kernel: postnet_cbhg_forward.6
= control target key start
LH: loop header
LB: loop body
LE: loop exit
PB: predicated region body
PF: predicated region fallthrough
CT: control target
= control target key end

     0   :  { %vm24_vm0 = vcmask 58368   ;;  %v288_v3 = vmov 0.0   ;;  %s350_s24 = smov 0   ;;  %s402_s0 = inlined_call_operand.vmem [shape: s32[2,1], index: 0, kind: input, shape index: {}]   ;;  %s403_s1 = inlined_call_operand.vmem [shape: f32[16,2,48], index: 1, kind: input, shape index: {}]   ;;  %s404_s2 = inlined_call_operand.vmem [shape: f32[2,8,24], index: 2, kind: input, shape index: {}]   ;;  %s405_s3 = inlined_call_operand.vmem [shape: f32[2,1,24], index: 3, kind: input, shape index: {}]   ;;  %s406_s4 = inlined_call_operand.vmem [shape: f32[16,2,16], index: 4, kind: output, shape index: {}]  }
   0x1   :  { %v326_v0 = vld [vmem:[%s402_s0] sm:$0x3]  ;;  %v336_v2 = vld [vmem:[%s404_s2 + $0x8] sm:$0xff]  ;;  %25 = vst.msk [vmem:[#allocation2] sm:$0x3] %vm24_vm0, %v288_v3 }
   0x2   :  { %v331_v1 = vld [vmem:[%s404_s2] sm:$0xff]  ;;  %26 = vst.msk [vmem:[#allocation3] sm:$0x3] %vm24_vm0, %v288_v3 }
   0x3   :  { %v342_v4 = vld [vmem:[%s405_s3] sm:$0x1]  ;;  %v347_v5 = vld [vmem:[%s405_s3 + $0x1] sm:$0x1] }
   0x4 LB: > { %152 = vmatpush.msra.mxu1 %v336_v2  ;;  %vm40_vm1 = vcmask 64512   ;;  %59 = vmatpush.msra.mxu0 %v331_v1  ;;  %v132_v8 = vperm.slane %v347_v5, 0  ;;  %s289_s2 = smov 8   ;;  %s290_s3 = smov 24   ;;  %v38_v11 = vperm.slane %v342_v4, 0  ;;  %v106_v29 = vstv %s286_s24  ;;  %s286_s24 = sphi %s350_s24, %s32_s24  }
   0x5   : > { %s291_s25 = smov 112   ;;  %s242_s26 = sshll.u32 %s286_s24, 1  ;;  %v292_v30 = vmov 0   ;;  %vm107_vm5 = vcmp.gt.s32.totalorder %v326_v0, %v106_v29  ;;  %vm221_vm14 = vcmask 123968  }
   0x6   : > { %s34_s29 = scalar_lea.vmem %s403_s1, %s242_s26  ;;  %s126_s30 = ssub.s32 15, %s286_s24  ;;  %266 = vset.pattern.permute.xlu0 %v292_v30  ;;  %267 = vset.pattern.permute.xlu1 %v292_v30  ;;  %v108_v32 = vsel %vm107_vm5, 1, %v292_v30 }
   0x7   : > { %v368_v14 = vld [vmem:[%s34_s29] sm:$0x3]  ;;  %s374_s5 = sshll.u32 %s126_s30, 1  ;;  %s293_s9 = smov 16   ;;  %v202_v57 = vstv %s126_s30 }
   0x8   : > { %v36_v7 = vld [vmem:[#allocation2] sm:$0x3]  ;;  %s128_s8 = scalar_lea.vmem %s403_s1, %s374_s5  ;;  %s294_s10 = smov 120   ;;  %vm203_vm11 = vcmp.gt.s32.totalorder %v326_v0, %v202_v57 }
   0x9   : > { %v356_v6 = vld [vmem:[#allocation3] sm:$0x3]  ;;  %243 = vmatmul.msk.f32.vlgmr.msra.gmra.mxu0 %vm40_vm1, %v36_v7  ;;  %v129_v23 = vld [vmem:[%s128_s8] sm:$0x3]  ;;  %v204_v59 = vsel %vm203_vm11, 1, %v292_v30  ;;  %s295_s11 = smov 32   ;;  %s124_s16 = scalar_lea.vmem %s406_s4, %s242_s26 }
   0xa   : > { %246 = vmatmul.msk.f32.vlgmr.msra.gmra.mxu1 %vm40_vm1, %v356_v6  ;;  %s296_s12 = smov 104   ;;  %s297_s13 = smov 96  }
   0xb   : > { %s220_s19 = scalar_lea.vmem %s406_s4, %s374_s5  ;;  %s32_s24 = sadd.s32 1, %s286_s24  }
   0xc   : > { %p29_p0 = scmp.ge.s32.totalorder %s32_s24, 16  }
  0x86   : > { %v61_v12 = vpop.f32.mrf.mxu0 }
  0x87   : > { %v154_v9 = vpop.f32.mrf.mxu1  ;;  %v62_v13 = vadd.f32 %v61_v12, %v38_v11 }
  0x88   : > { %v155_v10 = vadd.f32 %v154_v9, %v132_v8 }
  0x89   : > { %v64_v15 = vadd.f32 %v62_v13, %v368_v14 }
  0x8a   : > { %181 = vrot.lane.b32.xlu1 %v155_v10, %s289_s2  ;;  %158 = vrot.lane.b32.xlu0 %v155_v10, %s290_s3 }
  0x8b   : > { %v244_v16 = vmul.f32 -1.442695, %v64_v15 }
  0x8d   : > { %268 = vpow2.f32 %v244_v16 }
  0x92   : > { %85 = vrot.lane.b32.xlu0 %v62_v13, %s291_s25 }
  0x93   : > { %v269_v17 = vpop.eup %268 }
  0x94   : > { %v68_v18 = vadd.f32 1.0, %v269_v17 }
  0x96   : > { %270 = vrcp.f32 %v68_v18  ;;  %vm74_vm2 = vweird.f32 %v68_v18  ;;  %v78_v25 = vand.u32 2147483647, %v68_v18  ;;  %v80_v26 = vand.u32 2147483648, %v68_v18 }
  0x98   : > { %v81_v33 = vor.u32 1.1754944e-38, %v80_v26  ;;  %vm79_vm6 = vcmp.eq.f32.partialorder %v78_v25, 8.507059e+37 }
  0x9a   : > { %101 = vrot.lane.b32.xlu0 %v36_v7, %s289_s2 }
  0x9c   : > { %v271_v19 = vpop.eup %270 }
  0x9d   : > { %v70_v20 = vmul.f32 %v271_v19, %v68_v18  ;;  %vm75_vm3 = vweird.f32 %v271_v19 }
  0x9e   : > { %vm76_vm4 = vmor %vm74_vm2, %vm75_vm3 }
  0x9f   : > { %v71_v21 = vsub.f32 1.0, %v70_v20 }
  0xa1   : > { %v72_v22 = vmul.f32 %v271_v19, %v71_v21 }
  0xa2   : > { %110 = vperm.xlu0 %266, %v108_v32  }
  0xa3   : > { %v73_v28 = vadd.f32 %v271_v19, %v72_v22 }
  0xa5   : > { %v77_v34 = vsel %vm76_vm4, %v271_v19, %v73_v28 }
  0xa6   : > { %v82_v36 = vsel %vm79_vm6, %v81_v33, %v77_v34 }
  0xa7   : > { %v95_v61 = vsub.f32 1.0, %v82_v36 }
  0xfc   : > { %v159_v24 = vpop.permute.xlu0 %158  ;;  %v182_v49 = vpop.permute.xlu1 %181 }
  0xfd   : > { %v161_v27 = vadd.f32 %v159_v24, %v129_v23 }
  0xff   : > { %v247_v31 = vmul.f32 -1.442695, %v161_v27 }
 0x101   : > { %272 = vpow2.f32 %v247_v31 }
 0x104   : > { %v86_v35 = vpop.permute.xlu0 %85 }
 0x105   : > { %v88_v37 = vmul.f32 %v86_v35, %v82_v36 }
 0x107   : > { %v273_v38 = vpop.eup %272  ;;  %90 = vrot.lane.b32.xlu1 %v88_v37, %s293_s9 }
 0x108   : > { %v165_v39 = vadd.f32 1.0, %v273_v38 }
 0x10a   : > { %274 = vrcp.f32 %v165_v39  ;;  %v177_v43 = vand.u32 2147483648, %v165_v39  ;;  %v175_v45 = vand.u32 2147483647, %v165_v39  ;;  %vm171_vm8 = vweird.f32 %v165_v39 }
 0x10c   : > { %v178_v47 = vor.u32 1.1754944e-38, %v177_v43  ;;  %vm176_vm10 = vcmp.eq.f32.partialorder %v175_v45, 8.507059e+37  ;;  %v102_v60 = vpop.permute.xlu0 %101 }
 0x10d   : > { %v104_v3 = vmul.f32 %v102_v60, %v82_v36 }
 0x110   : > { %v275_v40 = vpop.eup %274 }
 0x111   : > { %v167_v41 = vmul.f32 %v275_v40, %v165_v39  ;;  %vm172_vm7 = vweird.f32 %v275_v40 }
 0x112   : > { %vm173_vm9 = vmor %vm171_vm8, %vm172_vm7 }
 0x113   : > { %v168_v42 = vsub.f32 1.0, %v167_v41 }
 0x114   : > { %v111_v62 = vpop.permute.xlu0 %110 }
 0x115   : > { %v169_v44 = vmul.f32 %v275_v40, %v168_v42  ;;  %vm112_vm12 = vcmp.eq.s32.totalorder %v111_v62, 1 }
 0x117   : > { %v170_v46 = vadd.f32 %v275_v40, %v169_v44 }
 0x119   : > { %v174_v48 = vsel %vm173_vm9, %v275_v40, %v170_v46 }
 0x11a   : > { %v179_v50 = vsel %vm176_vm10, %v178_v47, %v174_v48 }
 0x11b   : > { %v184_v51 = vmul.f32 %v182_v49, %v179_v50  ;;  %v191_v12 = vsub.f32 1.0, %v179_v50 }
 0x11d   : > { %186 = vrot.lane.b32.xlu2 %v184_v51, %s293_s9 }
 0x177   : > { %v187_v52 = vpop.permute.xlu2 %186 }
 0x178   : > { %v189_v53 = vadd.f32 %v187_v52, %v129_v23 }
 0x179   : > { %v91_v54 = vpop.permute.xlu1 %90 }
 0x17a   : > { %276 = vtanh.f32 %v189_v53  ;;  %v93_v55 = vadd.f32 %v91_v54, %v368_v14 }
 0x17c   : > { %278 = vtanh.f32 %v93_v55 }
 0x180   : > { %v277_v56 = vpop.eup %276 }
 0x181   : > { %193 = vrot.lane.b32.xlu1 %v277_v56, %s294_s10 }
 0x182   : > { %v279_v58 = vpop.eup %278 }
 0x183   : > { %97 = vrot.lane.b32.xlu2 %v279_v58, %s294_s10 }
 0x189   : > { %206 = vperm.xlu1 %267, %v204_v59  }
 0x18b   : > { %197 = vrot.lane.b32.xlu2 %v356_v6, %s295_s11 }
 0x1dd   : > { %v98_v63 = vpop.permute.xlu2 %97 }
 0x1de   : > { %v100_v7 = vmul.f32 %v98_v63, %v95_v61 }
 0x1e0   : > { %v105_v8 = vadd.f32 %v104_v3, %v100_v7 }
 0x1e2   : > { %v119_v9 = vsel %vm112_vm12, %v105_v8, 0.0  ;;  %v113_v10 = vsel %vm112_vm12, %v105_v8, %v102_v60 }
 0x1e3   : > { %121 = vrot.lane.b32.xlu2 %v119_v9, %s294_s10  ;;  %115 = vrot.lane.b32.xlu1 %v113_v10, %s294_s10 }
 0x1e5   : > { %v198_v13 = vpop.permute.xlu2 %197 }
 0x1e6   : > { %v200_v15 = vmul.f32 %v198_v13, %v179_v50 }
 0x1f3   : > { %v194_v11 = vpop.permute.xlu1 %193 }
 0x1f4   : > { %v196_v14 = vmul.f32 %v194_v11, %v191_v12 }
 0x1f6   : > { %v201_v16 = vadd.f32 %v200_v15, %v196_v14 }
 0x1fb   : > { %v207_v6 = vpop.permute.xlu1 %206 }
 0x1fc   : > { %vm208_vm13 = vcmp.eq.s32.totalorder %v207_v6, 1 }
 0x1fd   : > { %v215_v17 = vsel %vm208_vm13, %v201_v16, 0.0  ;;  %v209_v18 = vsel %vm208_vm13, %v201_v16, %v198_v13 }
 0x1fe   : > { %217 = vrot.lane.b32.xlu0 %v215_v17, %s296_s12  ;;  %211 = vrot.lane.b32.xlu2 %v209_v18, %s297_s13 }
 0x23d   : > { %v122_v19 = vpop.permute.xlu2 %121 }
 0x23e   : > { %125 = vst.msk [vmem:[%s124_s16] sm:$0x3] %vm24_vm0, %v122_v19 }
 0x255   : > { %v116_v20 = vpop.permute.xlu1 %115 }
 0x256   : > { %118 = vst.msk [vmem:[#allocation2] sm:$0x3] %vm24_vm0, %v116_v20 }
 0x258   : > { %v212_v21 = vpop.permute.xlu2 %211 }
 0x259   : > { %214 = vst.msk [vmem:[#allocation3] sm:$0x3] %vm24_vm0, %v212_v21 }
 0x26d   :  { %31 = sbr.rel (!%p29_p0) target bundleno = 4 (0x4), region = 49 }
 0x270   : > { %v218_v22 = vpop.permute.xlu0 %217 }
 0x271   : > { %222 = vst.msk [vmem:[%s220_s19] sm:$0x3] %vm221_vm14, %v218_v22 }

// kernel: postnet_cbhg_forward.5
= control target key start
LH: loop header
LB: loop body
LE: loop exit
PB: predicated region body
PF: predicated region fallthrough
CT: control target
= control target key end

     0   :  { %vm41_vm0 = vcmask 64512   ;;  %vm91_vm1 = vcmask 130048   ;;  %s1298_s1 = inlined_call_operand.vmem [shape: f32[8,16], index: 1, kind: input, shape index: {}]   ;;  %s1299_s0 = inlined_call_operand.vmem [shape: f32[32,8], index: 0, kind: input, shape index: {}]   ;;  %s1300_s2 = inlined_call_operand.vmem [shape: f32[1,16], index: 2, kind: input, shape index: {}]   ;;  %s1301_s4 = inlined_call_operand.vmem [shape: f32[4,16], index: 4, kind: input, shape index: {}]   ;;  %s1302_s3 = inlined_call_operand.vmem [shape: f32[4,16,16], index: 3, kind: input, shape index: {}]   ;;  %s1303_s5 = inlined_call_operand.vmem [shape: f32[4,16,16], index: 5, kind: input, shape index: {}]   ;;  %s1304_s6 = inlined_call_operand.vmem [shape: f32[4,16], index: 6, kind: input, shape index: {}]   ;;  %s1305_s8 = inlined_call_operand.vmem [shape: f32[1,48], index: 8, kind: input, shape index: {}]   ;;  %s1306_s7 = inlined_call_operand.vmem [shape: f32[16,48], index: 7, kind: input, shape index: {}]   ;;  %s1307_s9 = inlined_call_operand.vmem [shape: f32[32,48], index: 9, kind: output, shape index: {}]  }
   0x1   :  { %v36_v0 = vld [vmem:[%s1298_s1] sm:$0xff]  ;;  %v33_v2 = vld [vmem:[%s1299_s0 + $0x8] sm:$0xff]  ;;  %v34_v3 = vld [vmem:[%s1299_s0 + $0x10] sm:$0xff] }
   0x2   :  { %v32_v1 = vld [vmem:[%s1299_s0] sm:$0xff]  ;;  %69 = vmatpush.msra.mxu0 %v36_v0  ;;  %914 = vmatpush.msra.mxu3 %v36_v0  ;;  %v35_v4 = vld [vmem:[%s1299_s0 + $0x18] sm:$0xff]  ;;  %v88_v5 = vld [vmem:[%s1302_s3 + $0x8] sm:$0xff] }
   0x3   :  { %846 = vmatmul.msk.f32.vlgmr.msra.gmra.mxu0 %vm41_vm0, %v32_v1  ;;  %847 = vmatmul.msk.f32.vlgmr.msra.gmra.mxu3 %vm41_vm0, %v33_v2  ;;  %v87_v6 = vld [vmem:[%s1302_s3] sm:$0xff]  ;;  %v138_v7 = vld [vmem:[%s1303_s5 + $0x8] sm:$0xff]  ;;  %v869_v27 = vld [vmem:[%s1303_s5 + $0x18] sm:$0xff] }
   0x4   :  { %118 = vmatpush.msra.mxu1 %v88_v5  ;;  %915 = vmatpush.msra.mxu2 %v88_v5  ;;  %v137_v8 = vld [vmem:[%s1303_s5] sm:$0xff]  ;;  %v863_v28 = vld [vmem:[%s1302_s3 + $0x18] sm:$0xff]  ;;  %v868_v30 = vld [vmem:[%s1303_s5 + $0x10] sm:$0xff] }
   0x5   :  { %v917_v9 = vld [vmem:[%s1300_s2] ss:$0 sm:$0xff]  ;;  %331 = vmatpush.msrb.mxu0 %v869_v27  ;;  %293 = vmatpush.msrb.mxu3 %v863_v28  ;;  %v862_v31 = vld [vmem:[%s1302_s3 + $0x10] sm:$0xff] }
   0x6   :  { %119 = vmatpush.msra.mxu1 %v87_v6  ;;  %916 = vmatpush.msra.mxu2 %v87_v6  ;;  %v919_v24 = vld [vmem:[%s1304_s6] ss:$0 sm:$0xff] }
   0x7   :  { %332 = vmatpush.msrb.mxu0 %v868_v30  ;;  %294 = vmatpush.msrb.mxu3 %v862_v31  ;;  %v1117_v48 = vld [vmem:[%s1301_s4] ss:$0 sm:$0xff] }
   0x8   :  { %155 = vmatpush.msrb.mxu2 %v138_v7 }
   0xa   :  { %156 = vmatpush.msrb.mxu2 %v137_v8 }
   0xb   :  { %848 = vmatmul.msk.f32.gmra.mxu3 %vm41_vm0, %v34_v3 }
  0x13   :  { %849 = vmatmul.msk.f32.gmra.mxu3 %vm41_vm0, %v35_v4 }
  0x80   :  { %v71_v10 = vpop.f32.mrf.mxu0 }
  0x81   :  { %v72_v11 = vadd.f32 %v917_v9, %v71_v10 }
  0x83   :  { %v1071_v12 = vmax.f32 %v72_v11, 0.0 }
  0x85   :  { %850 = vmatmul.msk.f32.vlgmr.msra.gmra.mxu1 %vm91_vm1, %v1071_v12 }
  0x86   :  { %v74_v13 = vpop.f32.mrf.mxu3 }
  0x87   :  { %v75_v14 = vadd.f32 %v917_v9, %v74_v13 }
  0x89   :  { %v1075_v15 = vmax.f32 %v75_v14, 0.0 }
  0x8d   :  { %851 = vmatmul.msk.f32.gmra.mxu1 %vm91_vm1, %v1075_v15 }
  0x8e   :  { %v77_v16 = vpop.f32.mrf.mxu3 }
  0x8f   :  { %v78_v17 = vadd.f32 %v917_v9, %v77_v16 }
  0x91   :  { %v1079_v18 = vmax.f32 %v78_v17, 0.0 }
  0x93   :  { %852 = vmatmul.msk.f32.vlgmr.msra.gmra.mxu2 %vm91_vm1, %v1079_v18 }
  0x96   :  { %v80_v19 = vpop.f32.mrf.mxu3 }
  0x97   :  { %v81_v20 = vadd.f32 %v917_v9, %v80_v19 }
  0x99   :  { %v1083_v21 = vmax.f32 %v81_v20, 0.0 }
  0x9b   :  { %853 = vmatmul.msk.f32.gmra.mxu2 %vm91_vm1, %v1083_v21 }
  0xa3   :  { %854 = vmatmul.msk.f32.vlgmr.msrb.gmra.mxu2 %vm91_vm1, %v1071_v12 }
  0xab   :  { %855 = vmatmul.msk.f32.gmra.mxu2 %vm91_vm1, %v1075_v15 }
  0xb3   :  { %856 = vmatmul.msk.f32.gmra.mxu2 %vm91_vm1, %v1079_v18 }
  0xbb   :  { %857 = vmatmul.msk.f32.gmra.mxu2 %vm91_vm1, %v1083_v21 }
 0x102   :  { %v121_v44 = vpop.f32.mrf.mxu1 }
 0x103   :  { %v122_v53 = vadd.f32 %v1117_v48, %v121_v44 }
 0x105   :  { %v133_v62 = vmax.f32 %v122_v53, 0.0  ;;  %v885_v53 = vld [vmem:[%s1303_s5 + $0x28] sm:$0xff] }
 0x106   :  { %507 = vmatpush.msra.mxu2 %v885_v53 }
 0x10a   :  { %v124_v1 = vpop.f32.mrf.mxu1 }
 0x10b   :  { %v125_v8 = vadd.f32 %v1117_v48, %v124_v1 }
 0x10d   :  { %v134_v19 = vmax.f32 %v125_v8, 0.0 }
 0x116   :  { %v1095_v22 = vpop.f32.mrf.mxu2 }
 0x117   :  { %v128_v30 = vadd.f32 %v1117_v48, %v1095_v22 }
 0x11e   :  { %v1097_v23 = vpop.f32.mrf.mxu2 }
 0x11f   :  { %v131_v44 = vadd.f32 %v1117_v48, %v1097_v23 }
 0x126   :  { %v158_v25 = vpop.f32.mrf.mxu2 }
 0x127   :  { %v159_v26 = vadd.f32 %v919_v24, %v158_v25 }
 0x129   :  { %v858_v29 = vmul.f32 -1.442695, %v159_v26 }
 0x12b   :  { %927 = vpow2.f32 %v858_v29 }
 0x12e   :  { %v161_v32 = vpop.f32.mrf.mxu2 }
 0x12f   :  { %v162_v33 = vadd.f32 %v919_v24, %v161_v32 }
 0x131   :  { %v928_v34 = vpop.eup %927  ;;  %v859_v35 = vmul.f32 -1.442695, %v162_v33 }
 0x132   :  { %v182_v36 = vadd.f32 1.0, %v928_v34 }
 0x133   :  { %929 = vpow2.f32 %v859_v35 }
 0x134   :  { %931 = vrcp.f32 %v182_v36  ;;  %v197_v47 = vand.u32 2147483648, %v182_v36  ;;  %v195_v51 = vand.u32 2147483647, %v182_v36  ;;  %vm191_vm3 = vweird.f32 %v182_v36 }
 0x136   :  { %v164_v37 = vpop.f32.mrf.mxu2  ;;  %v198_v58 = vor.u32 1.1754944e-38, %v197_v47  ;;  %vm196_vm5 = vcmp.eq.f32.partialorder %v195_v51, 8.507059e+37 }
 0x137   :  { %v165_v38 = vadd.f32 %v919_v24, %v164_v37  ;;  %v135_v37 = vmax.f32 %v128_v30, 0.0 }
 0x139   :  { %v930_v39 = vpop.eup %929  ;;  %v860_v40 = vmul.f32 -1.442695, %v165_v38 }
 0x13a   :  { %v932_v41 = vpop.eup %931  ;;  %v183_v42 = vadd.f32 1.0, %v930_v39 }
 0x13b   :  { %v187_v43 = vmul.f32 %v932_v41, %v182_v36  ;;  %933 = vpow2.f32 %v860_v40  ;;  %vm192_vm2 = vweird.f32 %v932_v41 }
 0x13c   :  { %935 = vrcp.f32 %v183_v42  ;;  %vm193_vm4 = vmor %vm191_vm3, %vm192_vm2  ;;  %v210_v2 = vand.u32 2147483647, %v183_v42  ;;  %v212_v3 = vand.u32 2147483648, %v183_v42  ;;  %vm206_vm7 = vweird.f32 %v183_v42 }
 0x13d   :  { %v188_v45 = vsub.f32 1.0, %v187_v43 }
 0x13e   :  { %v167_v46 = vpop.f32.mrf.mxu2  ;;  %v213_v14 = vor.u32 1.1754944e-38, %v212_v3  ;;  %vm211_vm9 = vcmp.eq.f32.partialorder %v210_v2, 8.507059e+37 }
 0x13f   :  { %v189_v49 = vmul.f32 %v932_v41, %v188_v45  ;;  %v168_v50 = vadd.f32 %v919_v24, %v167_v46 }
 0x141   :  { %v934_v52 = vpop.eup %933  ;;  %v861_v54 = vmul.f32 -1.442695, %v168_v50  ;;  %v190_v55 = vadd.f32 %v932_v41, %v189_v49  ;;  %v136_v50 = vmax.f32 %v131_v44, 0.0 }
 0x142   :  { %v936_v56 = vpop.eup %935  ;;  %v184_v57 = vadd.f32 1.0, %v934_v52 }
 0x143   :  { %v202_v59 = vmul.f32 %v936_v56, %v183_v42  ;;  %937 = vpow2.f32 %v861_v54  ;;  %v194_v60 = vsel %vm193_vm4, %v932_v41, %v190_v55  ;;  %vm207_vm6 = vweird.f32 %v936_v56  ;;  %v920_v54 = vld [vmem:[%s1304_s6 + $0x1] ss:$0 sm:$0xff] }
 0x144   :  { %939 = vrcp.f32 %v184_v57  ;;  %v199_v61 = vsel %vm196_vm5, %v198_v58, %v194_v60  ;;  %vm208_vm8 = vmor %vm206_vm7, %vm207_vm6  ;;  %v225_v25 = vand.u32 2147483647, %v184_v57  ;;  %v227_v26 = vand.u32 2147483648, %v184_v57  ;;  %v884_v58 = vld [vmem:[%s1303_s5 + $0x20] sm:$0xff] }
 0x145   :  { %v203_v63 = vsub.f32 1.0, %v202_v59  ;;  %v250_v0 = vsub.f32 1.0, %v199_v61  ;;  %v246_v4 = vmul.f32 %v199_v61, %v133_v62  ;;  %vm221_vm11 = vweird.f32 %v184_v57  ;;  %v878_v59 = vld [vmem:[%s1302_s3 + $0x20] sm:$0xff]  ;;  %508 = vmatpush.msra.mxu2 %v884_v58 }
 0x146   :  { %v228_v34 = vor.u32 1.1754944e-38, %v227_v26  ;;  %vm226_vm13 = vcmp.eq.f32.partialorder %v225_v25, 8.507059e+37 }
 0x147   :  { %v254_v5 = vmul.f32 %v250_v0, %v1071_v12  ;;  %v204_v6 = vmul.f32 %v936_v56, %v203_v63 }
 0x149   :  { %v938_v7 = vpop.eup %937  ;;  %v1122_v9 = vadd.f32 %v254_v5, %v246_v4  ;;  %v205_v10 = vadd.f32 %v936_v56, %v204_v6 }
 0x14a   :  { %v940_v11 = vpop.eup %939  ;;  %v185_v13 = vadd.f32 1.0, %v938_v7 }
 0x14b   :  { %v217_v16 = vmul.f32 %v940_v11, %v184_v57  ;;  %864 = vmatmul.msk.f32.vlgmr.msrb.gmra.mxu3 %vm91_vm1, %v1122_v9  ;;  %870 = vmatmul.msk.f32.vlgmr.msrb.gmra.mxu0 %vm91_vm1, %v1122_v9  ;;  %v209_v12 = vsel %vm208_vm8, %v936_v56, %v205_v10  ;;  %vm222_vm10 = vweird.f32 %v940_v11  ;;  %v1171_v10 = vld [vmem:[%s1301_s4 + $0x1] ss:$0 sm:$0xff] }
 0x14c   :  { %941 = vrcp.f32 %v185_v13  ;;  %v214_v17 = vsel %vm211_vm9, %v213_v14, %v209_v12  ;;  %vm223_vm12 = vmor %vm221_vm11, %vm222_vm10  ;;  %v240_v39 = vand.u32 2147483647, %v185_v13  ;;  %v242_v40 = vand.u32 2147483648, %v185_v13 }
 0x14d   :  { %v218_v20 = vsub.f32 1.0, %v217_v16  ;;  %v251_v24 = vsub.f32 1.0, %v214_v17  ;;  %v247_v27 = vmul.f32 %v214_v17, %v134_v19  ;;  %vm236_vm15 = vweird.f32 %v185_v13 }
 0x14e   :  { %v243_v47 = vor.u32 1.1754944e-38, %v242_v40  ;;  %vm241_vm2 = vcmp.eq.f32.partialorder %v240_v39, 8.507059e+37 }
 0x14f   :  { %v255_v28 = vmul.f32 %v251_v24, %v1075_v15  ;;  %v219_v29 = vmul.f32 %v940_v11, %v218_v20 }
 0x151   :  { %v1131_v31 = vadd.f32 %v255_v28, %v247_v27  ;;  %v220_v32 = vadd.f32 %v940_v11, %v219_v29 }
 0x152   :  { %v942_v33 = vpop.eup %941 }
 0x153   :  { %v232_v35 = vmul.f32 %v942_v33, %v185_v13  ;;  %865 = vmatmul.msk.f32.gmra.mxu3 %vm91_vm1, %v1131_v31  ;;  %871 = vmatmul.msk.f32.gmra.mxu0 %vm91_vm1, %v1131_v31  ;;  %v224_v15 = vsel %vm223_vm12, %v940_v11, %v220_v32  ;;  %vm237_vm14 = vweird.f32 %v942_v33 }
 0x154   :  { %v229_v36 = vsel %vm226_vm13, %v228_v34, %v224_v15  ;;  %vm238_vm0 = vmor %vm236_vm15, %vm237_vm14 }
 0x155   :  { %v233_v38 = vsub.f32 1.0, %v232_v35  ;;  %v252_v22 = vsub.f32 1.0, %v229_v36  ;;  %v248_v41 = vmul.f32 %v229_v36, %v135_v37 }
 0x157   :  { %v256_v42 = vmul.f32 %v252_v22, %v1079_v18  ;;  %v234_v43 = vmul.f32 %v942_v33, %v233_v38 }
 0x159   :  { %v1140_v45 = vadd.f32 %v256_v42, %v248_v41  ;;  %v235_v46 = vadd.f32 %v942_v33, %v234_v43 }
 0x15b   :  { %866 = vmatmul.msk.f32.gmra.mxu3 %vm91_vm1, %v1140_v45  ;;  %872 = vmatmul.msk.f32.gmra.mxu0 %vm91_vm1, %v1140_v45  ;;  %v239_v49 = vsel %vm238_vm0, %v942_v33, %v235_v46 }
 0x15c   :  { %v244_v18 = vsel %vm241_vm2, %v243_v47, %v239_v49 }
 0x15d   :  { %v253_v51 = vsub.f32 1.0, %v244_v18  ;;  %v249_v52 = vmul.f32 %v244_v18, %v136_v50 }
 0x15f   :  { %v257_v23 = vmul.f32 %v253_v51, %v1083_v21  ;;  %v879_v21 = vld [vmem:[%s1302_s3 + $0x28] sm:$0xff] }
 0x160   :  { %469 = vmatpush.msrb.mxu1 %v879_v21 }
 0x161   :  { %v1147_v48 = vadd.f32 %v257_v23, %v249_v52 }
 0x162   :  { %470 = vmatpush.msrb.mxu1 %v878_v59 }
 0x163   :  { %867 = vmatmul.msk.f32.gmra.mxu3 %vm91_vm1, %v1147_v48  ;;  %873 = vmatmul.msk.f32.gmra.mxu0 %vm91_vm1, %v1147_v48 }
 0x1c8   :  { %v334_v55 = vpop.f32.mrf.mxu0 }
 0x1c9   :  { %v335_v56 = vadd.f32 %v920_v54, %v334_v55 }
 0x1cb   :  { %v874_v57 = vmul.f32 -1.442695, %v335_v56 }
 0x1cd   :  { %943 = vpow2.f32 %v874_v57 }
 0x1ce   :  { %v296_v3 = vpop.f32.mrf.mxu3 }
 0x1cf   :  { %v297_v20 = vadd.f32 %v1171_v10, %v296_v3 }
 0x1d0   :  { %v337_v60 = vpop.f32.mrf.mxu0 }
 0x1d1   :  { %v338_v61 = vadd.f32 %v920_v54, %v337_v60  ;;  %v308_v34 = vmax.f32 %v297_v20, 0.0 }
 0x1d3   :  { %v944_v62 = vpop.eup %943  ;;  %v875_v63 = vmul.f32 -1.442695, %v338_v61 }
 0x1d4   :  { %v358_v0 = vadd.f32 1.0, %v944_v62 }
 0x1d5   :  { %945 = vpow2.f32 %v875_v63 }
 0x1d6   :  { %947 = vrcp.f32 %v358_v0  ;;  %v373_v13 = vand.u32 2147483648, %v358_v0  ;;  %v371_v12 = vand.u32 2147483647, %v358_v0  ;;  %vm367_vm4 = vweird.f32 %v358_v0  ;;  %v299_v28 = vpop.f32.mrf.mxu3 }
 0x1d7   :  { %v300_v42 = vadd.f32 %v1171_v10, %v299_v28 }
 0x1d8   :  { %v340_v1 = vpop.f32.mrf.mxu0  ;;  %v374_v27 = vor.u32 1.1754944e-38, %v373_v13  ;;  %vm372_vm6 = vcmp.eq.f32.partialorder %v371_v12, 8.507059e+37 }
 0x1d9   :  { %v341_v2 = vadd.f32 %v920_v54, %v340_v1  ;;  %v309_v51 = vmax.f32 %v300_v42, 0.0 }
 0x1db   :  { %v946_v4 = vpop.eup %945  ;;  %v876_v5 = vmul.f32 -1.442695, %v341_v2 }
 0x1dc   :  { %v948_v6 = vpop.eup %947  ;;  %v359_v7 = vadd.f32 1.0, %v946_v4 }
 0x1dd   :  { %v363_v8 = vmul.f32 %v948_v6, %v358_v0  ;;  %949 = vpow2.f32 %v876_v5  ;;  %vm368_vm3 = vweird.f32 %v948_v6 }
 0x1de   :  { %951 = vrcp.f32 %v359_v7  ;;  %vm369_vm5 = vmor %vm367_vm4, %vm368_vm3  ;;  %v386_v36 = vand.u32 2147483647, %v359_v7  ;;  %v388_v37 = vand.u32 2147483648, %v359_v7  ;;  %vm382_vm8 = vweird.f32 %v359_v7  ;;  %v302_v50 = vpop.f32.mrf.mxu3 }
 0x1df   :  { %v364_v11 = vsub.f32 1.0, %v363_v8  ;;  %v303_v57 = vadd.f32 %v1171_v10, %v302_v50 }
 0x1e0   :  { %v343_v14 = vpop.f32.mrf.mxu0  ;;  %v389_v46 = vor.u32 1.1754944e-38, %v388_v37  ;;  %vm387_vm10 = vcmp.eq.f32.partialorder %v386_v36, 8.507059e+37 }
 0x1e1   :  { %v365_v16 = vmul.f32 %v948_v6, %v364_v11  ;;  %v344_v17 = vadd.f32 %v920_v54, %v343_v14 }
 0x1e3   :  { %v950_v19 = vpop.eup %949  ;;  %v366_v24 = vadd.f32 %v948_v6, %v365_v16  ;;  %v877_v25 = vmul.f32 -1.442695, %v344_v17 }
 0x1e4   :  { %v952_v26 = vpop.eup %951  ;;  %v360_v29 = vadd.f32 1.0, %v950_v19 }
 0x1e5   :  { %v370_v30 = vsel %vm369_vm5, %v948_v6, %v366_v24  ;;  %v378_v32 = vmul.f32 %v952_v26, %v359_v7  ;;  %953 = vpow2.f32 %v877_v25  ;;  %vm383_vm7 = vweird.f32 %v952_v26  ;;  %v901_v25 = vld [vmem:[%s1303_s5 + $0x38] sm:$0xff] }
 0x1e6   :  { %v375_v33 = vsel %vm372_vm6, %v374_v27, %v370_v30  ;;  %955 = vrcp.f32 %v360_v29  ;;  %vm384_vm9 = vmor %vm382_vm8, %vm383_vm7  ;;  %v401_v53 = vand.u32 2147483647, %v360_v29  ;;  %v403_v54 = vand.u32 2147483648, %v360_v29  ;;  %v305_v3 = vpop.f32.mrf.mxu3  ;;  %683 = vmatpush.msra.mxu0 %v901_v25  ;;  %v900_v30 = vld [vmem:[%s1303_s5 + $0x30] sm:$0xff] }
 0x1e7   :  { %v426_v35 = vsub.f32 1.0, %v375_v33  ;;  %v379_v15 = vsub.f32 1.0, %v378_v32  ;;  %v422_v38 = vmul.f32 %v375_v33, %v308_v34  ;;  %vm397_vm12 = vweird.f32 %v360_v29  ;;  %v894_v32 = vld [vmem:[%s1302_s3 + $0x30] sm:$0xff] }
 0x1e8   :  { %v404_v61 = vor.u32 1.1754944e-38, %v403_v54  ;;  %vm402_vm14 = vcmp.eq.f32.partialorder %v401_v53, 8.507059e+37  ;;  %v306_v11 = vadd.f32 %v1171_v10, %v305_v3  ;;  %684 = vmatpush.msra.mxu0 %v900_v30 }
 0x1e9   :  { %v430_v22 = vmul.f32 %v426_v35, %v1122_v9  ;;  %v380_v39 = vmul.f32 %v952_v26, %v379_v15 }
 0x1ea   :  { %v311_v19 = vmax.f32 %v306_v11, 0.0 }
 0x1eb   :  { %v954_v40 = vpop.eup %953  ;;  %v1175_v41 = vadd.f32 %v430_v22, %v422_v38  ;;  %v381_v43 = vadd.f32 %v952_v26, %v380_v39 }
 0x1ec   :  { %v956_v44 = vpop.eup %955  ;;  %v361_v47 = vadd.f32 1.0, %v954_v40 }
 0x1ed   :  { %v385_v49 = vsel %vm384_vm9, %v952_v26, %v381_v43  ;;  %v393_v18 = vmul.f32 %v956_v44, %v360_v29  ;;  %880 = vmatmul.msk.f32.vlgmr.msrb.gmra.mxu1 %vm91_vm1, %v1175_v41  ;;  %886 = vmatmul.msk.f32.vlgmr.msra.gmra.mxu2 %vm91_vm1, %v1175_v41  ;;  %vm398_vm11 = vweird.f32 %v956_v44  ;;  %v923_v26 = vld [vmem:[%s1304_s6 + $0x2] ss:$0 sm:$0xff] }
 0x1ee   :  { %v390_v9 = vsel %vm387_vm10, %v389_v46, %v385_v49  ;;  %957 = vrcp.f32 %v361_v47  ;;  %vm399_vm13 = vmor %vm397_vm12, %vm398_vm11  ;;  %v416_v4 = vand.u32 2147483647, %v361_v47  ;;  %v418_v5 = vand.u32 2147483648, %v361_v47  ;;  %v1223_v46 = vld [vmem:[%s1301_s4 + $0x2] ss:$0 sm:$0xff] }
 0x1ef   :  { %v427_v52 = vsub.f32 1.0, %v390_v9  ;;  %v394_v23 = vsub.f32 1.0, %v393_v18  ;;  %v423_v55 = vmul.f32 %v390_v9, %v309_v51  ;;  %vm412_vm0 = vweird.f32 %v361_v47 }
 0x1f0   :  { %v419_v16 = vor.u32 1.1754944e-38, %v418_v5  ;;  %vm417_vm3 = vcmp.eq.f32.partialorder %v416_v4, 8.507059e+37 }
 0x1f1   :  { %v395_v56 = vmul.f32 %v956_v44, %v394_v23  ;;  %v431_v21 = vmul.f32 %v427_v52, %v1131_v31  ;;  %v310_v31 = vmax.f32 %v303_v57, 0.0 }
 0x1f3   :  { %v396_v58 = vadd.f32 %v956_v44, %v395_v56  ;;  %v1184_v59 = vadd.f32 %v431_v21, %v423_v55 }
 0x1f4   :  { %v958_v60 = vpop.eup %957 }
 0x1f5   :  { %v400_v62 = vsel %vm399_vm13, %v956_v44, %v396_v58  ;;  %v408_v63 = vmul.f32 %v958_v60, %v361_v47  ;;  %881 = vmatmul.msk.f32.gmra.mxu1 %vm91_vm1, %v1184_v59  ;;  %887 = vmatmul.msk.f32.gmra.mxu2 %vm91_vm1, %v1184_v59  ;;  %vm413_vm15 = vweird.f32 %v958_v60 }
 0x1f6   :  { %v405_v0 = vsel %vm402_vm14, %v404_v61, %v400_v62  ;;  %vm414_vm2 = vmor %vm412_vm0, %vm413_vm15 }
 0x1f7   :  { %v428_v1 = vsub.f32 1.0, %v405_v0  ;;  %v409_v2 = vsub.f32 1.0, %v408_v63  ;;  %v424_v6 = vmul.f32 %v405_v0, %v310_v31 }
 0x1f9   :  { %v410_v7 = vmul.f32 %v958_v60, %v409_v2  ;;  %v432_v8 = vmul.f32 %v428_v1, %v1140_v45 }
 0x1fb   :  { %v411_v13 = vadd.f32 %v958_v60, %v410_v7  ;;  %v1192_v14 = vadd.f32 %v432_v8, %v424_v6 }
 0x1fd   :  { %v415_v12 = vsel %vm414_vm2, %v958_v60, %v411_v13  ;;  %882 = vmatmul.msk.f32.gmra.mxu1 %vm91_vm1, %v1192_v14  ;;  %888 = vmatmul.msk.f32.gmra.mxu2 %vm91_vm1, %v1192_v14 }
 0x1fe   :  { %v420_v17 = vsel %vm417_vm3, %v419_v16, %v415_v12 }
 0x1ff   :  { %v429_v20 = vsub.f32 1.0, %v420_v17  ;;  %v425_v45 = vmul.f32 %v420_v17, %v311_v19 }
 0x201   :  { %v433_v10 = vmul.f32 %v429_v20, %v1147_v48  ;;  %v895_v48 = vld [vmem:[%s1302_s3 + $0x38] sm:$0xff] }
 0x202   :  { %645 = vmatpush.msra.mxu3 %v895_v48 }
 0x203   :  { %v1199_v24 = vadd.f32 %v433_v10, %v425_v45 }
 0x204   :  { %646 = vmatpush.msra.mxu3 %v894_v32 }
 0x205   :  { %883 = vmatmul.msk.f32.gmra.mxu1 %vm91_vm1, %v1199_v24  ;;  %889 = vmatmul.msk.f32.gmra.mxu2 %vm91_vm1, %v1199_v24 }
 0x26a   :  { %v472_v22 = vpop.f32.mrf.mxu1 }
 0x26b   :  { %v473_v23 = vadd.f32 %v1223_v46, %v472_v22 }
 0x26d   :  { %v484_v62 = vmax.f32 %v473_v23, 0.0 }
 0x270   :  { %v510_v27 = vpop.f32.mrf.mxu2 }
 0x271   :  { %v511_v28 = vadd.f32 %v923_v26, %v510_v27 }
 0x272   :  { %v475_v21 = vpop.f32.mrf.mxu1 }
 0x273   :  { %v890_v29 = vmul.f32 -1.442695, %v511_v28  ;;  %v476_v6 = vadd.f32 %v1223_v46, %v475_v21 }
 0x275   :  { %959 = vpow2.f32 %v890_v29  ;;  %v485_v20 = vmax.f32 %v476_v6, 0.0 }
 0x278   :  { %v513_v33 = vpop.f32.mrf.mxu2 }
 0x279   :  { %v514_v34 = vadd.f32 %v923_v26, %v513_v33 }
 0x27a   :  { %v478_v17 = vpop.f32.mrf.mxu1 }
 0x27b   :  { %v960_v35 = vpop.eup %959  ;;  %v891_v15 = vmul.f32 -1.442695, %v514_v34  ;;  %v479_v29 = vadd.f32 %v1223_v46, %v478_v17 }
 0x27c   :  { %v534_v36 = vadd.f32 1.0, %v960_v35 }
 0x27d   :  { %961 = vpow2.f32 %v891_v15 }
 0x27e   :  { %963 = vrcp.f32 %v534_v36  ;;  %v549_v49 = vand.u32 2147483648, %v534_v36  ;;  %v547_v50 = vand.u32 2147483647, %v534_v36  ;;  %vm543_vm5 = vweird.f32 %v534_v36 }
 0x280   :  { %v516_v37 = vpop.f32.mrf.mxu2  ;;  %v550_v56 = vor.u32 1.1754944e-38, %v549_v49  ;;  %vm548_vm7 = vcmp.eq.f32.partialorder %v547_v50, 8.507059e+37 }
 0x281   :  { %v517_v38 = vadd.f32 %v923_v26, %v516_v37 }
 0x282   :  { %v481_v22 = vpop.f32.mrf.mxu1 }
 0x283   :  { %v962_v39 = vpop.eup %961  ;;  %v892_v40 = vmul.f32 -1.442695, %v517_v38 }
 0x284   :  { %v964_v42 = vpop.eup %963  ;;  %v535_v43 = vadd.f32 1.0, %v962_v39 }
 0x285   :  { %v539_v44 = vmul.f32 %v964_v42, %v534_v36  ;;  %965 = vpow2.f32 %v892_v40  ;;  %vm544_vm4 = vweird.f32 %v964_v42  ;;  %v486_v36 = vmax.f32 %v479_v29, 0.0 }
 0x286   :  { %967 = vrcp.f32 %v535_v43  ;;  %vm545_vm6 = vmor %vm543_vm5, %vm544_vm4  ;;  %v562_v31 = vand.u32 2147483647, %v535_v43  ;;  %v564_v1 = vand.u32 2147483648, %v535_v43  ;;  %vm558_vm9 = vweird.f32 %v535_v43 }
 0x287   :  { %v540_v47 = vsub.f32 1.0, %v539_v44 }
 0x288   :  { %v519_v18 = vpop.f32.mrf.mxu2  ;;  %v565_v16 = vor.u32 1.1754944e-38, %v564_v1  ;;  %vm563_vm11 = vcmp.eq.f32.partialorder %v562_v31, 8.507059e+37 }
 0x289   :  { %v541_v9 = vmul.f32 %v964_v42, %v540_v47  ;;  %v520_v51 = vadd.f32 %v923_v26, %v519_v18  ;;  %v482_v47 = vadd.f32 %v1223_v46, %v481_v22 }
 0x28b   :  { %v966_v52 = vpop.eup %965  ;;  %v542_v53 = vadd.f32 %v964_v42, %v541_v9  ;;  %v893_v54 = vmul.f32 -1.442695, %v520_v51 }
 0x28c   :  { %v968_v55 = vpop.eup %967  ;;  %v536_v57 = vadd.f32 1.0, %v966_v52 }
 0x28d   :  { %v554_v58 = vmul.f32 %v968_v55, %v535_v43  ;;  %969 = vpow2.f32 %v893_v54  ;;  %v546_v60 = vsel %vm545_vm6, %v964_v42, %v542_v53  ;;  %vm559_vm8 = vweird.f32 %v968_v55  ;;  %v791_v54 = vld [vmem:[%s1306_s7 + $0x8] sm:$0xff] }
 0x28e   :  { %971 = vrcp.f32 %v536_v57  ;;  %v551_v61 = vsel %vm548_vm7, %v550_v56, %v546_v60  ;;  %vm560_vm10 = vmor %vm558_vm9, %vm559_vm8  ;;  %v577_v25 = vand.u32 2147483647, %v536_v57  ;;  %v579_v26 = vand.u32 2147483648, %v536_v57  ;;  %822 = vmatpush.msra.mxu1 %v791_v54 }
 0x28f   :  { %v555_v63 = vsub.f32 1.0, %v554_v58  ;;  %v602_v0 = vsub.f32 1.0, %v551_v61  ;;  %v598_v2 = vmul.f32 %v551_v61, %v484_v62  ;;  %vm573_vm13 = vweird.f32 %v536_v57 }
 0x290   :  { %v580_v34 = vor.u32 1.1754944e-38, %v579_v26  ;;  %vm578_vm15 = vcmp.eq.f32.partialorder %v577_v25, 8.507059e+37 }
 0x291   :  { %v606_v3 = vmul.f32 %v602_v0, %v1175_v41  ;;  %v556_v4 = vmul.f32 %v968_v55, %v555_v63 }
 0x293   :  { %v970_v5 = vpop.eup %969  ;;  %v1228_v7 = vadd.f32 %v606_v3, %v598_v2  ;;  %v557_v8 = vadd.f32 %v968_v55, %v556_v4 }
 0x294   :  { %v972_v11 = vpop.eup %971  ;;  %v537_v13 = vadd.f32 1.0, %v970_v5 }
 0x295   :  { %v569_v12 = vmul.f32 %v972_v11, %v536_v57  ;;  %896 = vmatmul.msk.f32.vlgmr.msra.gmra.mxu3 %vm91_vm1, %v1228_v7  ;;  %902 = vmatmul.msk.f32.vlgmr.msra.gmra.mxu0 %vm91_vm1, %v1228_v7  ;;  %v561_v41 = vsel %vm560_vm10, %v968_v55, %v557_v8  ;;  %vm574_vm12 = vweird.f32 %v972_v11  ;;  %v924_v55 = vld [vmem:[%s1304_s6 + $0x3] ss:$0 sm:$0xff] }
 0x296   :  { %973 = vrcp.f32 %v537_v13  ;;  %v566_v19 = vsel %vm563_vm11, %v565_v16, %v561_v41  ;;  %vm575_vm14 = vmor %vm573_vm13, %vm574_vm12  ;;  %v592_v39 = vand.u32 2147483647, %v537_v13  ;;  %v594_v40 = vand.u32 2147483648, %v537_v13  ;;  %v790_v57 = vld [vmem:[%s1306_s7] sm:$0xff] }
 0x297   :  { %v570_v45 = vsub.f32 1.0, %v569_v12  ;;  %v603_v10 = vsub.f32 1.0, %v566_v19  ;;  %v599_v27 = vmul.f32 %v566_v19, %v485_v20  ;;  %vm588_vm2 = vweird.f32 %v537_v13  ;;  %823 = vmatpush.msra.mxu1 %v790_v57  ;;  %v1269_v8 = vld [vmem:[%s1301_s4 + $0x3] ss:$0 sm:$0xff] }
 0x298   :  { %v595_v9 = vor.u32 1.1754944e-38, %v594_v40  ;;  %vm593_vm4 = vcmp.eq.f32.partialorder %v592_v39, 8.507059e+37 }
 0x299   :  { %v607_v28 = vmul.f32 %v603_v10, %v1184_v59  ;;  %v571_v48 = vmul.f32 %v972_v11, %v570_v45 }
 0x29b   :  { %v1236_v30 = vadd.f32 %v607_v28, %v599_v27  ;;  %v572_v32 = vadd.f32 %v972_v11, %v571_v48 }
 0x29c   :  { %v974_v33 = vpop.eup %973 }
 0x29d   :  { %v584_v35 = vmul.f32 %v974_v33, %v537_v13  ;;  %897 = vmatmul.msk.f32.gmra.mxu3 %vm91_vm1, %v1236_v30  ;;  %903 = vmatmul.msk.f32.gmra.mxu0 %vm91_vm1, %v1236_v30  ;;  %v576_v15 = vsel %vm575_vm14, %v972_v11, %v572_v32  ;;  %vm589_vm0 = vweird.f32 %v974_v33 }
 0x29e   :  { %v581_v59 = vsel %vm578_vm15, %v580_v34, %v576_v15  ;;  %vm590_vm3 = vmor %vm588_vm2, %vm589_vm0 }
 0x29f   :  { %v585_v37 = vsub.f32 1.0, %v584_v35  ;;  %v604_v38 = vsub.f32 1.0, %v581_v59  ;;  %v600_v42 = vmul.f32 %v581_v59, %v486_v36 }
 0x2a1   :  { %v608_v43 = vmul.f32 %v604_v38, %v1192_v14  ;;  %v586_v44 = vmul.f32 %v974_v33, %v585_v37  ;;  %v487_v14 = vmax.f32 %v482_v47, 0.0 }
 0x2a3   :  { %v1244_v49 = vadd.f32 %v608_v43, %v600_v42  ;;  %v587_v18 = vadd.f32 %v974_v33, %v586_v44 }
 0x2a5   :  { %898 = vmatmul.msk.f32.gmra.mxu3 %vm91_vm1, %v1244_v49  ;;  %904 = vmatmul.msk.f32.gmra.mxu0 %vm91_vm1, %v1244_v49  ;;  %v591_v50 = vsel %vm590_vm3, %v974_v33, %v587_v18 }
 0x2a6   :  { %v596_v51 = vsel %vm593_vm4, %v595_v9, %v591_v50 }
 0x2a7   :  { %v605_v52 = vsub.f32 1.0, %v596_v51  ;;  %v601_v23 = vmul.f32 %v596_v51, %v487_v14 }
 0x2a9   :  { %v609_v46 = vmul.f32 %v605_v52, %v1199_v24 }
 0x2ab   :  { %v1251_v53 = vadd.f32 %v609_v46, %v601_v23 }
 0x2ad   :  { %899 = vmatmul.msk.f32.gmra.mxu3 %vm91_vm1, %v1251_v53  ;;  %905 = vmatmul.msk.f32.gmra.mxu0 %vm91_vm1, %v1251_v53 }
 0x312   :  { %v686_v56 = vpop.f32.mrf.mxu0 }
 0x313   :  { %v687_v21 = vadd.f32 %v924_v55, %v686_v56 }
 0x315   :  { %v906_v24 = vmul.f32 -1.442695, %v687_v21 }
 0x317   :  { %975 = vpow2.f32 %v906_v24 }
 0x318   :  { %v648_v1 = vpop.f32.mrf.mxu3 }
 0x319   :  { %v649_v20 = vadd.f32 %v1269_v8, %v648_v1 }
 0x31a   :  { %v689_v58 = vpop.f32.mrf.mxu0 }
 0x31b   :  { %v690_v60 = vadd.f32 %v924_v55, %v689_v58  ;;  %v660_v33 = vmax.f32 %v649_v20, 0.0 }
 0x31d   :  { %v976_v61 = vpop.eup %975  ;;  %v907_v62 = vmul.f32 -1.442695, %v690_v60 }
 0x31e   :  { %v710_v63 = vadd.f32 1.0, %v976_v61 }
 0x31f   :  { %977 = vpow2.f32 %v907_v62 }
 0x320   :  { %979 = vrcp.f32 %v710_v63  ;;  %v725_v13 = vand.u32 2147483648, %v710_v63  ;;  %v723_v41 = vand.u32 2147483647, %v710_v63  ;;  %vm719_vm6 = vweird.f32 %v710_v63  ;;  %v651_v27 = vpop.f32.mrf.mxu3 }
 0x321   :  { %v652_v40 = vadd.f32 %v1269_v8, %v651_v27 }
 0x322   :  { %v692_v0 = vpop.f32.mrf.mxu0  ;;  %v726_v26 = vor.u32 1.1754944e-38, %v725_v13  ;;  %vm724_vm8 = vcmp.eq.f32.partialorder %v723_v41, 8.507059e+37 }
 0x323   :  { %v693_v31 = vadd.f32 %v924_v55, %v692_v0 }
 0x325   :  { %v978_v2 = vpop.eup %977  ;;  %v908_v3 = vmul.f32 -1.442695, %v693_v31 }
 0x326   :  { %v980_v4 = vpop.eup %979  ;;  %v711_v5 = vadd.f32 1.0, %v978_v2 }
 0x327   :  { %v715_v6 = vmul.f32 %v980_v4, %v710_v63  ;;  %981 = vpow2.f32 %v908_v3  ;;  %vm720_vm5 = vweird.f32 %v980_v4 }
 0x328   :  { %983 = vrcp.f32 %v711_v5  ;;  %vm721_vm7 = vmor %vm719_vm6, %vm720_vm5  ;;  %v738_v15 = vand.u32 2147483647, %v711_v5  ;;  %v740_v59 = vand.u32 2147483648, %v711_v5  ;;  %vm734_vm10 = vweird.f32 %v711_v5  ;;  %v654_v51 = vpop.f32.mrf.mxu3 }
 0x329   :  { %v716_v11 = vsub.f32 1.0, %v715_v6  ;;  %v655_v21 = vadd.f32 %v1269_v8, %v654_v51  ;;  %vm837_vm6 = vcmask 392192  }
 0x32a   :  { %v695_v16 = vpop.f32.mrf.mxu0  ;;  %v741_v44 = vor.u32 1.1754944e-38, %v740_v59  ;;  %vm739_vm12 = vcmp.eq.f32.partialorder %v738_v15, 8.507059e+37 }
 0x32b   :  { %v717_v12 = vmul.f32 %v980_v4, %v716_v11  ;;  %v696_v17 = vadd.f32 %v924_v55, %v695_v16  ;;  %v662_v0 = vmax.f32 %v655_v21, 0.0 }
 0x32d   :  { %v982_v19 = vpop.eup %981  ;;  %v718_v45 = vadd.f32 %v980_v4, %v717_v12  ;;  %v909_v10 = vmul.f32 -1.442695, %v696_v17 }
 0x32e   :  { %v984_v25 = vpop.eup %983  ;;  %v712_v28 = vadd.f32 1.0, %v982_v19 }
 0x32f   :  { %v722_v48 = vsel %vm721_vm7, %v980_v4, %v718_v45  ;;  %v730_v29 = vmul.f32 %v984_v25, %v711_v5  ;;  %985 = vpow2.f32 %v909_v10  ;;  %vm735_vm9 = vweird.f32 %v984_v25 }
 0x330   :  { %v727_v32 = vsel %vm724_vm8, %v726_v26, %v722_v48  ;;  %987 = vrcp.f32 %v712_v28  ;;  %vm736_vm11 = vmor %vm734_vm10, %vm735_vm9  ;;  %v753_v23 = vand.u32 2147483647, %v712_v28  ;;  %v755_v46 = vand.u32 2147483648, %v712_v28  ;;  %v657_v2 = vpop.f32.mrf.mxu3 }
 0x331   :  { %v778_v34 = vsub.f32 1.0, %v727_v32  ;;  %v731_v35 = vsub.f32 1.0, %v730_v29  ;;  %v774_v36 = vmul.f32 %v727_v32, %v660_v33  ;;  %vm749_vm14 = vweird.f32 %v712_v28 }
 0x332   :  { %v756_v60 = vor.u32 1.1754944e-38, %v755_v46  ;;  %vm754_vm0 = vcmp.eq.f32.partialorder %v753_v23, 8.507059e+37  ;;  %v658_v11 = vadd.f32 %v1269_v8, %v657_v2 }
 0x333   :  { %v782_v37 = vmul.f32 %v778_v34, %v1228_v7  ;;  %v732_v38 = vmul.f32 %v984_v25, %v731_v35  ;;  %v661_v7 = vmax.f32 %v652_v40, 0.0 }
 0x334   :  { %v663_v19 = vmax.f32 %v658_v11, 0.0 }
 0x335   :  { %v986_v22 = vpop.eup %985  ;;  %v786_v39 = vadd.f32 %v782_v37, %v774_v36  ;;  %v733_v42 = vadd.f32 %v984_v25, %v732_v38 }
 0x336   :  { %v988_v43 = vpop.eup %987  ;;  %v713_v47 = vadd.f32 1.0, %v986_v22 }
 0x337   :  { %v737_v18 = vsel %vm736_vm11, %v984_v25, %v733_v42  ;;  %v745_v9 = vmul.f32 %v988_v43, %v712_v28  ;;  %910 = vmatmul.msk.f32.vlgmr.msra.gmra.mxu1 %vm91_vm1, %v786_v39  ;;  %vm750_vm13 = vweird.f32 %v988_v43 }
 0x338   :  { %v742_v50 = vsel %vm739_vm12, %v741_v44, %v737_v18  ;;  %989 = vrcp.f32 %v713_v47  ;;  %vm751_vm15 = vmor %vm749_vm14, %vm750_vm13  ;;  %v768_v3 = vand.u32 2147483647, %v713_v47  ;;  %vm764_vm3 = vweird.f32 %v713_v47 }
 0x339   :  { %v779_v14 = vsub.f32 1.0, %v742_v50  ;;  %v746_v52 = vsub.f32 1.0, %v745_v9  ;;  %v775_v54 = vmul.f32 %v742_v50, %v661_v7 }
 0x33a   :  { %vm769_vm5 = vcmp.eq.f32.partialorder %v768_v3, 8.507059e+37 }
 0x33b   :  { %v747_v55 = vmul.f32 %v988_v43, %v746_v52  ;;  %v783_v56 = vmul.f32 %v779_v14, %v1236_v30  ;;  %v770_v30 = vand.u32 2147483648, %v713_v47 }
 0x33d   :  { %v748_v24 = vadd.f32 %v988_v43, %v747_v55  ;;  %v787_v57 = vadd.f32 %v783_v56, %v775_v54  ;;  %v771_v12 = vor.u32 1.1754944e-38, %v770_v30 }
 0x33e   :  { %v990_v58 = vpop.eup %989 }
 0x33f   :  { %v752_v61 = vsel %vm751_vm15, %v988_v43, %v748_v24  ;;  %v760_v62 = vmul.f32 %v990_v58, %v713_v47  ;;  %911 = vmatmul.msk.f32.gmra.mxu1 %vm91_vm1, %v787_v57  ;;  %vm765_vm2 = vweird.f32 %v990_v58 }
 0x340   :  { %v757_v63 = vsel %vm754_vm0, %v756_v60, %v752_v61  ;;  %vm766_vm4 = vmor %vm764_vm3, %vm765_vm2 }
 0x341   :  { %v780_v31 = vsub.f32 1.0, %v757_v63  ;;  %v761_v1 = vsub.f32 1.0, %v760_v62  ;;  %v776_v4 = vmul.f32 %v757_v63, %v662_v0 }
 0x343   :  { %v762_v5 = vmul.f32 %v990_v58, %v761_v1  ;;  %v784_v6 = vmul.f32 %v780_v31, %v1244_v49  ;;  %v926_v49 = vld [vmem:[%s1305_s8] ss:$0 sm:$0xff] }
 0x345   :  { %v763_v13 = vadd.f32 %v990_v58, %v762_v5  ;;  %v788_v16 = vadd.f32 %v784_v6, %v776_v4 }
 0x347   :  { %v767_v41 = vsel %vm766_vm4, %v990_v58, %v763_v13  ;;  %912 = vmatmul.msk.f32.gmra.mxu1 %vm91_vm1, %v788_v16 }
 0x348   :  { %v772_v17 = vsel %vm769_vm5, %v771_v12, %v767_v41 }
 0x349   :  { %v781_v20 = vsub.f32 1.0, %v772_v17  ;;  %v777_v45 = vmul.f32 %v772_v17, %v663_v19 }
 0x34b   :  { %v785_v10 = vmul.f32 %v781_v20, %v1251_v53 }
 0x34d   :  { %v789_v25 = vadd.f32 %v785_v10, %v777_v45 }
 0x34f   :  { %913 = vmatmul.msk.f32.gmra.mxu1 %vm91_vm1, %v789_v25 }
 0x3b4   :  { %v825_v8 = vpop.f32.mrf.mxu1 }
 0x3b5   :  { %v826_v26 = vadd.f32 %v926_v49, %v825_v8 }
 0x3b7   :  { %838 = vst.msk [vmem:[%s1307_s9] sm:$0xff] %vm837_vm6, %v826_v26 }
 0x3bc   :  { %v828_v27 = vpop.f32.mrf.mxu1 }
 0x3bd   :  { %v829_v28 = vadd.f32 %v926_v49, %v828_v27 }
 0x3bf   :  { %839 = vst.msk [vmem:[%s1307_s9 + $0x8] sm:$0xff] %vm837_vm6, %v829_v28 }
 0x3c4   :  { %v831_v53 = vpop.f32.mrf.mxu1 }
 0x3c5   :  { %v832_v48 = vadd.f32 %v926_v49, %v831_v53 }
 0x3c7   :  { %840 = vst.msk [vmem:[%s1307_s9 + $0x10] sm:$0xff] %vm837_vm6, %v832_v48 }
 0x3cc   :  { %v834_v29 = vpop.f32.mrf.mxu1 }
 0x3cd   :  { %v835_v32 = vadd.f32 %v926_v49, %v834_v29 }
 0x3cf   :  { %841 = vst.msk [vmem:[%s1307_s9 + $0x18] sm:$0xff] %vm837_vm6, %v835_v32 }

// kernel: postnet_cbhg_forward.4
= control target key start
LH: loop header
LB: loop body
LE: loop exit
PB: predicated region body
PF: predicated region fallthrough
CT: control target
= control target key end

     0   :  { %s852_s24 = smov 0   ;;  %s995_s0 = inlined_call_operand.vmem [shape: f32[2,19,8], index: 0, kind: input, shape index: {}]   ;;  %s996_s1 = inlined_call_operand.vmem [shape: f32[4,8,32], index: 1, kind: input, shape index: {}]   ;;  %s997_s2 = inlined_call_operand.vmem [shape: f32[1,32], index: 2, kind: input, shape index: {}]   ;;  %s998_s3 = inlined_call_operand.vmem [shape: f32[3,32,16], index: 3, kind: input, shape index: {}]   ;;  %s999_s4 = inlined_call_operand.vmem [shape: f32[1,16], index: 4, kind: input, shape index: {}]   ;;  %s1000_s5 = inlined_call_operand.vmem [shape: f32[3,16,8], index: 5, kind: input, shape index: {}]   ;;  %s1001_s6 = inlined_call_operand.vmem [shape: f32[1,8], index: 6, kind: input, shape index: {}]   ;;  %s1002_s7 = inlined_call_operand.vmem [shape: f32[2,16,8], index: 7, kind: output, shape index: {}]  }
   0x1 LB: > { %s742_s25 = sadd.s32 4294967295, %s809_s24   ;;  %p746_p0 = scmp.ge.s32.totalorder %s809_s24, 1  ;;  %s809_s24 = sphi %s852_s24, %s17_s24  }
   0x2   : > { %p237_p1 = scmp.lt.s32.totalorder %s809_s24, 3 }
   0x4   : > { %p238_p2 = pnand %p746_p0, %p237_p1 }
   0x5   : > { %p269_p3 = scmp.lt.s32.totalorder (!%p238_p2), %s742_s25, 1 }
   0x6   : > { %241 = sbr.rel (%p238_p2) target bundleno = 493 (0x1ed), region = 48 }
   0xb   : > { %v750_v0 = vld [vmem:[%s996_s1 + $0x8] sm:$0xff]  ;;  %v282_v1 = vld [vmem:[%s996_s1] sm:$0xff]  ;;  %v755_v2 = vld [vmem:[%s996_s1 + $0x10] sm:$0xff]  ;;  %s1004_s25 = smov (!%p269_p3, %s742_s25), 1  ;;  %vm294_vm0 = vcmask 64512   ;;  %vm288_vm1 = vcmask 1046528  }
   0xc   : > { %788 = vmatpush.msra.mxu2 %v750_v0  ;;  %789 = vmatpush.msra.mxu3 %v282_v1  ;;  %v758_v3 = vld [vmem:[%s996_s1 + $0x18] sm:$0xff]  ;;  %s790_s11 = smul.u32 24, %s1004_s25  ;;  %vm388_vm2 = vcmask 1044480   ;;  %vm351_vm3 = vcmask 1045504   ;;  %vm434_vm4 = vcmask 253952   ;;  %vm431_vm5 = vcmask 261120  }
   0xd   : > { %314 = vmatpush.msra.mxu0 %v750_v0  ;;  %341 = vmatpush.msra.mxu1 %v282_v1  ;;  %v811_v22 = vmov 0.0   ;;  %v772_v25 = vld [vmem:[%s998_s3 + $0x58] sm:$0xff]  ;;  %vm444_vm6 = vcmask 254976   ;;  %v771_v28 = vld [vmem:[%s998_s3 + $0x50] sm:$0xff]  ;;  %v770_v29 = vld [vmem:[%s998_s3 + $0x48] sm:$0xff]  ;;  %vm565_vm7 = vcmask 130048  }
   0xe   : > { %376 = vmatpush.msrb.mxu2 %v755_v2  ;;  %413 = vmatpush.msrb.mxu3 %v758_v3  ;;  %s273_s14 = scalar_lea.vmem %s995_s0, %s790_s11  ;;  %435 = vst.msk [vmem:[#allocation2 + $0x10] sm:$0x1] %vm434_vm4, %v811_v22  ;;  %v764_v30 = vld [vmem:[%s998_s3 + $0x38] sm:$0xff]  ;;  %v763_v32 = vld [vmem:[%s998_s3 + $0x30] sm:$0xff]  ;;  %v769_v35 = vld [vmem:[%s998_s3 + $0x40] sm:$0xff]  ;;  %vm568_vm8 = vcmask 123904  }
   0xf   : > { %v280_v4 = vld [vmem:[%s273_s14 + $0x8] sm:$0xff]  ;;  %v281_v5 = vld [vmem:[%s273_s14 + $0x10] sm:$0x7]  ;;  %v279_v6 = vld [vmem:[%s273_s14] sm:$0xff]  ;;  %442 = vst.msk [vmem:[#allocation3] sm:$0xff] %vm431_vm5, %v811_v22  ;;  %479 = vmatpush.msrb.mxu0 %v764_v30  ;;  %s787_s15 = sshll.u32 %s1004_s25, 4 }
  0x10   : > { %v290_v7 = vrot.slane %v280_v4, 1  ;;  %v292_v8 = vrot.slane %v281_v5, 1  ;;  %754 = vmatmul.msk.f32.vlgmr.msra.gmra.mxu3 %vm294_vm0, %v280_v4  ;;  %753 = vmatmul.msk.f32.vlgmr.msra.gmra.mxu1 %vm294_vm0, %v279_v6  ;;  %v389_v9 = vrot.slane %v279_v6, 3  ;;  %v390_v10 = vrot.slane %v280_v4, 3  ;;  %443 = vst.msk [vmem:[#allocation3 + $0x8] sm:$0xff] %vm431_vm5, %v811_v22  ;;  %v453_v31 = vld [vmem:[%s998_s3 + $0x18] sm:$0xff]  ;;  %s278_s18 = scalar_lea.vmem %s1002_s7, %s787_s15 }
  0x11   : > { %v289_v11 = vrot.slane %v279_v6, 1  ;;  %v352_v14 = vrot.slane %v279_v6, 2  ;;  %v353_v15 = vrot.slane %v280_v4, 2  ;;  %v392_v18 = vrot.slane %v281_v5, 3  ;;  %445 = vst.msk [vmem:[#allocation3 + $0x10] sm:$0x3] %vm444_vm6, %v811_v22  ;;  %508 = vmatpush.msrb.mxu1 %v453_v31  ;;  %480 = vmatpush.msrb.mxu0 %v763_v32 }
  0x12   : > { %v880_v12 = vsel %vm288_vm1, %v290_v7, %v292_v8  ;;  %v391_v16 = vsel %vm388_vm2, %v389_v9, %v390_v10  ;;  %v355_v19 = vrot.slane %v281_v5, 2  ;;  %v452_v33 = vld [vmem:[%s998_s3 + $0x10] sm:$0xff]  ;;  %v762_v36 = vld [vmem:[%s998_s3 + $0x28] sm:$0xff]  ;;  %v761_v39 = vld [vmem:[%s998_s3 + $0x20] sm:$0xff]  ;;  %566 = vst.msk [vmem:[#allocation4] sm:$0xff] %vm565_vm7, %v811_v22 }
  0x13   : > { %752 = vmatmul.msk.f32.vlgmr.msra.gmra.mxu2 %vm294_vm0, %v880_v12  ;;  %v884_v13 = vsel %vm288_vm1, %v289_v11, %v290_v7  ;;  %v354_v17 = vsel %vm351_vm3, %v352_v14, %v353_v15  ;;  %v393_v20 = vsel %vm388_vm2, %v390_v10, %v392_v18  ;;  %v451_v38 = vld [vmem:[%s998_s3 + $0x8] sm:$0xff]  ;;  %509 = vmatpush.msrb.mxu1 %v452_v33  ;;  %v450_v41 = vld [vmem:[%s998_s3] sm:$0xff]  ;;  %v776_v2 = vld [vmem:[%s1000_s5 + $0x18] sm:$0xff] }
  0x14   : > { %751 = vmatmul.msk.f32.vlgmr.msra.gmra.mxu0 %vm294_vm0, %v884_v13  ;;  %v356_v21 = vsel %vm351_vm3, %v353_v15, %v355_v19  ;;  %544 = vmatpush.msra.mxu2 %v772_v25  ;;  %v800_v43 = vld [vmem:[%s997_s2] ss:$0 sm:$0xff]  ;;  %567 = vst.msk [vmem:[#allocation4 + $0x8] sm:$0xff] %vm565_vm7, %v811_v22  ;;  %v575_v3 = vld [vmem:[%s1000_s5 + $0x8] sm:$0xff]  ;;  %v775_v4 = vld [vmem:[%s1000_s5 + $0x10] sm:$0xff] }
  0x15   : > { %481 = vmatpush.msrb.mxu0 %v762_v36  ;;  %510 = vmatpush.msrb.mxu1 %v451_v38  ;;  %v782_v5 = vld [vmem:[%s1000_s5 + $0x28] sm:$0xff]  ;;  %569 = vst.msk [vmem:[#allocation4 + $0x10] sm:$0x3] %vm568_vm8, %v811_v22  ;;  %v574_v6 = vld [vmem:[%s1000_s5] sm:$0xff] }
  0x16   : > { %545 = vmatpush.msra.mxu2 %v771_v28  ;;  %601 = vmatpush.msra.mxu3 %v776_v2  ;;  %v781_v7 = vld [vmem:[%s1000_s5 + $0x20] sm:$0xff] }
  0x17   : > { %482 = vmatpush.msrb.mxu0 %v761_v39  ;;  %511 = vmatpush.msrb.mxu1 %v450_v41  ;;  %v801_v11 = vld [vmem:[%s999_s4] ss:$0 sm:$0xff] }
  0x18   : > { %759 = vmatmul.msk.f32.vlgmr.msrb.gmra.mxu3 %vm294_vm0, %v391_v16  ;;  %546 = vmatpush.msra.mxu2 %v770_v29 }
  0x19   : > { %630 = vmatpush.msra.mxu0 %v575_v3  ;;  %602 = vmatpush.msra.mxu3 %v775_v4 }
  0x1a   : > { %547 = vmatpush.msra.mxu2 %v769_v35  ;;  %664 = vmatpush.msra.mxu1 %v782_v5 }
  0x1b   : > { %756 = vmatmul.msk.f32.vlgmr.msrb.gmra.mxu2 %vm294_vm0, %v354_v17  ;;  %631 = vmatpush.msra.mxu0 %v574_v6 }
  0x1c   : > { %665 = vmatpush.msra.mxu1 %v781_v7 }
  0x20   : > { %760 = vmatmul.msk.f32.gmra.mxu3 %vm294_vm0, %v393_v20 }
  0x23   : > { %757 = vmatmul.msk.f32.gmra.mxu2 %vm294_vm0, %v356_v21 }
  0x8d   : > { %v343_v27 = vpop.f32.mrf.mxu1 }
  0x91   : > { %v316_v26 = vpop.f32.mrf.mxu0 }
  0x92   : > { %v344_v34 = vadd.f32 %v343_v27, %v316_v26 }
  0x93   : > { %v346_v23 = vpop.f32.mrf.mxu3 }
  0x96   : > { %v319_v24 = vpop.f32.mrf.mxu2 }
  0x97   : > { %v347_v46 = vadd.f32 %v346_v23, %v319_v24 }
  0x9b   : > { %v415_v37 = vpop.f32.mrf.mxu3 }
  0x9e   : > { %v378_v40 = vpop.f32.mrf.mxu2 }
  0x9f   : > { %v384_v42 = vadd.f32 %v378_v40, %v344_v34  ;;  %v802_v34 = vld [vmem:[%s1001_s6] ss:$0 sm:$0xff] }
  0xa1   : > { %v421_v44 = vadd.f32 %v415_v37, %v384_v42 }
  0xa3   : > { %v427_v45 = vadd.f32 %v800_v43, %v421_v44  ;;  %v418_v49 = vpop.f32.mrf.mxu3 }
  0xa5   : > { %v429_v47 = vmax.f32 %v427_v45, 0.0 }
  0xa6   : > { %v381_v48 = vpop.f32.mrf.mxu2 }
  0xa7   : > { %432 = vst.msk [vmem:[#allocation2] sm:$0xff] %vm431_vm5, %v429_v47  ;;  %v385_v50 = vadd.f32 %v381_v48, %v347_v46 }
  0xa9   : > { %v422_v51 = vadd.f32 %v418_v49, %v385_v50 }
  0xab   : > { %v428_v52 = vadd.f32 %v800_v43, %v422_v51 }
  0xad   : > { %v430_v53 = vmax.f32 %v428_v52, 0.0 }
  0xae   : > { %v436_v54 = vld [vmem:[#allocation2] sm:$0xff] }
  0xaf   : > { %433 = vst.msk [vmem:[#allocation2 + $0x8] sm:$0xff] %vm431_vm5, %v430_v53 }
  0xb6   : > { %v437_v55 = vld [vmem:[#allocation2 + $0x8] sm:$0xff] }
  0xb7   : > { %v438_v56 = vld [vmem:[#allocation2 + $0x1] sm:$0xff]  ;;  %v439_v57 = vld [vmem:[#allocation2 + $0x9] sm:$0xff] }
  0xb8   : > { %v440_v58 = vmax.f32 %v436_v54, %v438_v56  ;;  %v441_v59 = vmax.f32 %v437_v55, %v439_v57 }
  0xba   : > { %446 = vst.msk [vmem:[#allocation3 + $0x1] sm:$0xff] %vm431_vm5, %v440_v58 }
  0xbb   : > { %447 = vst.msk [vmem:[#allocation3 + $0x9] sm:$0xff] %vm431_vm5, %v441_v59 }
  0xc1   : > { %v454_v60 = vld [vmem:[#allocation3 + $0x1] sm:$0xff] }
  0xc2   : > { %v448_v61 = vld [vmem:[#allocation3] sm:$0xff]  ;;  %765 = vmatmul.msk.f32.vlgmr.msrb.gmra.mxu0 %vm431_vm5, %v454_v60  ;;  %v455_v63 = vld [vmem:[#allocation3 + $0x9] sm:$0xff] }
  0xc3   : > { %767 = vmatmul.msk.f32.vlgmr.msrb.gmra.mxu1 %vm431_vm5, %v448_v61  ;;  %v519_v62 = vld [vmem:[#allocation3 + $0x2] sm:$0xff]  ;;  %v520_v1 = vld [vmem:[#allocation3 + $0xa] sm:$0xff] }
  0xc4   : > { %773 = vmatmul.msk.f32.vlgmr.msra.gmra.mxu2 %vm431_vm5, %v519_v62  ;;  %v449_v0 = vld [vmem:[#allocation3 + $0x8] sm:$0xff] }
  0xca   : > { %766 = vmatmul.msk.f32.gmra.mxu0 %vm431_vm5, %v455_v63 }
  0xcb   : > { %768 = vmatmul.msk.f32.gmra.mxu1 %vm431_vm5, %v449_v0 }
  0xcc   : > { %774 = vmatmul.msk.f32.gmra.mxu2 %vm431_vm5, %v520_v1 }
 0x13f   : > { %v484_v8 = vpop.f32.mrf.mxu0 }
 0x140   : > { %v513_v9 = vpop.f32.mrf.mxu1 }
 0x141   : > { %v514_v10 = vadd.f32 %v513_v9, %v484_v8 }
 0x147   : > { %v549_v14 = vpop.f32.mrf.mxu2  ;;  %v487_v17 = vpop.f32.mrf.mxu0 }
 0x148   : > { %v555_v15 = vadd.f32 %v549_v14, %v514_v10  ;;  %v516_v18 = vpop.f32.mrf.mxu1 }
 0x149   : > { %v517_v20 = vadd.f32 %v516_v18, %v487_v17 }
 0x14a   : > { %v561_v16 = vadd.f32 %v801_v11, %v555_v15 }
 0x14c   : > { %v563_v19 = vmax.f32 %v561_v16, 0.0 }
 0x14e   : > { %570 = vst.msk [vmem:[#allocation4 + $0x1] sm:$0xff] %vm565_vm7, %v563_v19 }
 0x14f   : > { %v552_v21 = vpop.f32.mrf.mxu2 }
 0x150   : > { %v556_v22 = vadd.f32 %v552_v21, %v517_v20 }
 0x152   : > { %v562_v23 = vadd.f32 %v801_v11, %v556_v22 }
 0x154   : > { %v564_v24 = vmax.f32 %v562_v23, 0.0 }
 0x155   : > { %v576_v25 = vld [vmem:[#allocation4 + $0x1] sm:$0xff] }
 0x156   : > { %v572_v26 = vld [vmem:[#allocation4] sm:$0xff]  ;;  %571 = vst.msk [vmem:[#allocation4 + $0x9] sm:$0xff] %vm565_vm7, %v564_v24  ;;  %777 = vmatmul.msk.f32.vlgmr.msra.gmra.mxu3 %vm565_vm7, %v576_v25 }
 0x157   : > { %779 = vmatmul.msk.f32.vlgmr.msra.gmra.mxu0 %vm565_vm7, %v572_v26 }
 0x15d   : > { %v577_v27 = vld [vmem:[#allocation4 + $0x9] sm:$0xff] }
 0x15e   : > { %v573_v28 = vld [vmem:[#allocation4 + $0x8] sm:$0xff]  ;;  %778 = vmatmul.msk.f32.gmra.mxu3 %vm565_vm7, %v577_v27 }
 0x15f   : > { %v639_v29 = vld [vmem:[#allocation4 + $0x2] sm:$0xff]  ;;  %780 = vmatmul.msk.f32.gmra.mxu0 %vm565_vm7, %v573_v28  ;;  %v640_v30 = vld [vmem:[#allocation4 + $0xa] sm:$0xff] }
 0x160   : > { %783 = vmatmul.msk.f32.vlgmr.msra.gmra.mxu1 %vm565_vm7, %v639_v29 }
 0x168   : > { %784 = vmatmul.msk.f32.gmra.mxu1 %vm565_vm7, %v640_v30 }
 0x1d4   : > { %v633_v31 = vpop.f32.mrf.mxu0 }
 0x1d9   : > { %v604_v32 = vpop.f32.mrf.mxu3 }
 0x1da   : > { %v634_v33 = vadd.f32 %v633_v31, %v604_v32 }
 0x1dc   : > { %v636_v38 = vpop.f32.mrf.mxu0 }
 0x1dd   : > { %v667_v35 = vpop.f32.mrf.mxu1 }
 0x1de   : > { %v673_v36 = vadd.f32 %v667_v35, %v634_v33 }
 0x1e0   : > { %v679_v37 = vadd.f32 %v802_v34, %v673_v36 }
 0x1e1   : > { %v607_v40 = vpop.f32.mrf.mxu3 }
 0x1e2   : > { %v683_v39 = vadd.f32 %v679_v37, %v884_v13  ;;  %v637_v41 = vadd.f32 %v636_v38, %v607_v40 }
 0x1e4   : > { %685 = vst.msk [vmem:[%s278_s18] sm:$0xff] %vm294_vm0, %v683_v39 }
 0x1e5   : > { %v670_v42 = vpop.f32.mrf.mxu1 }
 0x1e6   : > { %v674_v43 = vadd.f32 %v670_v42, %v637_v41 }
 0x1e8   : > { %v680_v44 = vadd.f32 %v802_v34, %v674_v43 }
 0x1ea   : > { %v684_v45 = vadd.f32 %v680_v44, %v880_v12 }
 0x1ec   : > { %686 = vst.msk [vmem:[%s278_s18 + $0x8] sm:$0xff] %vm294_vm0, %v684_v45 }
 0x1ed PF: > { %s17_s24 = sadd.s32 1, %s809_s24  }
 0x1ee   : > { %p14_p4 = scmp.ge.s32.totalorder %s17_s24, 4  }
 0x1f0   :  { %16 = sbr.rel (!%p14_p4) target bundleno = 1 (0x1), region = 85 }

</bundles_post_ra>
